<compile_context>
chip_gen: v7x
topology: tpu7x:2x2x1
jax: 0.10.0
libtpu: 0.0.40
codegen_flags: <defaults>
</compile_context>

<pallas_src>
import numpy as np
import jax
import jax.numpy as jnp
from jax.experimental import pallas as pl
from jax.experimental.pallas import tpu as pltpu

# ---- module configuration (from the notebook) ----
NS = (11, 80)                                   # [chebyshev N, fourier N]
DOMAINS = ((0.0, 1.0 / 100.0), (0.0, 2.0 * np.pi))
EPS = 1e-14

N1, N2 = NS
N1P = 16                                        # padded chebyshev dim (sublane-friendly K)
N2H = N2 // 2                                   # Nyquist index (40)
D0_LO, D0_HI = DOMAINS[0]
D1_LO, D1_HI = DOMAINS[1]
D0_LEN = D0_HI - D0_LO
D1_LEN = D1_HI - D1_LO

# ---- host-side constants (float64 numpy, built once) ----
_i = np.linspace(0.0, 1.0, N1)
NODES_STD = np.cos(np.pi * _i)                  # standard Chebyshev nodes, (N1,)
CHEB_W = np.ones(N1)
CHEB_W[0] *= 0.5
CHEB_W[-1] *= 0.5
CHEB_W[1::2] = -1.0                             # barycentric weights, (N1,)

# padded nodes/weights: dummy nodes far outside [-1,1], weight 0 -> zero contribution
NODES_PAD = np.full(N1P, 3.0)
NODES_PAD[:N1] = NODES_STD
W_PAD = np.zeros(N1P)
W_PAD[:N1] = CHEB_W

# Real-symmetry-folded DFT analysis tables.
#   Re(c_k) =  sum_n v[n] cos(2*pi*k*n/N),   -Im(c_k) = sum_n v[n] sin(2*pi*k*n/N)
#   Re(ifft-style sum)/N = [ Re(c_0) + Re(c_40) cos(40x)
#                            + sum_{k=1}^{39} 2 Re(c_k) cos(kx) + 2 (-Im(c_k)) sin(kx) ] / N
# Weights (1 for DC/Nyquist, 2 for interior) and the 1/N are folded into the tables.
K_COS = np.arange(0, N2H + 1)                   # 41 cos frequencies: 0..40
K_SIN = np.arange(1, N2H)                       # 39 sin frequencies: 1..39
_n = np.arange(N2)
W_COS = np.where((K_COS == 0) | (K_COS == N2H), 1.0, 2.0) / N2
W_SIN = np.full(K_SIN.shape, 2.0) / N2
COS_TBL = np.cos((2.0 * np.pi / N2) * np.outer(_n, K_COS)) * W_COS     # (N2, 41)
SIN_TBL = np.sin((2.0 * np.pi / N2) * np.outer(_n, K_SIN)) * W_SIN     # (N2, 39)

# Evaluation-side folded frequency column and phase column (cos rows | sin rows);
# cos(theta - pi/2) = sin(theta), so a single cos() covers both halves.
K_FOLD = np.concatenate([K_COS, K_SIN]).astype(np.float32).reshape(N2, 1)          # (80,1)
PHASE_FOLD = np.concatenate(
    [np.zeros(K_COS.shape[0]), np.full(K_SIN.shape[0], -0.5 * np.pi)]
).astype(np.float32).reshape(N2, 1)                                                # (80,1)

K_FFT = np.fft.fftfreq(N2) * N2                 # for the pure-JAX reference only


def _round_up(x, m):
    return ((x + m - 1) // m) * m


def spectral_interp_kernel(x1_ref, x2_ref, nodes_ref, w_ref, k_ref, ph_ref, t_ref,
                           out_ref, tc_ref):
    # grid = (n_j, n_i):  axis 0 = m2 tile ("parallel"), axis 1 = m1 tile ("arbitrary").
    i = pl.program_id(1)

    # ---- stage 2 basis: computed ONCE per m2 tile (i == 0), cached in VMEM scratch ----
    #   theta = k * x2_std + phase            (N2, tn)  [cos rows | sin rows]
    #   cs    = cos(theta)                    (N2, tn)  f32 (|theta| ~ 250 rad -> keep f32)
    #   TC    = T @ cs                        (N1P, tn) f32 accumulate
    # T folds values @ (cos|sin) DFT tables, the 2/N and 1/N weights and the
    # Chebyshev-dim zero padding, so padded rows of TC are exactly 0.
    @pl.when(i == 0)
    def _():
        x2 = x2_ref[...]                                           # (1, tn)
        x2s = 2.0 * jnp.pi * (x2 - D1_LO) / D1_LEN                 # fourier to_standard
        theta = k_ref[...] * x2s + ph_ref[...]                     # (N2, tn)
        cs = jnp.cos(theta)
        prec = (jax.lax.Precision.HIGHEST if t_ref.dtype == jnp.float32
                else jax.lax.Precision.DEFAULT)
        tc_ref[...] = jnp.dot(t_ref[...], cs.astype(t_ref.dtype),
                              preferred_element_type=jnp.float32,
                              precision=prec)

    # ---- stage 1: barycentric Chebyshev interpolation along dim 0 ----
    x1 = x1_ref[...]                                               # (tm, 1)
    nodes = nodes_ref[...]                                         # (1, N1P)
    w = w_ref[...]                                                 # (1, N1P)

    x1s = 2.0 * (x1 - D0_LO) / D0_LEN - 1.0                        # cheb to_standard
    d_x = x1s - nodes                                              # (tm, N1P)
    small = jnp.abs(d_x) < EPS
    small_any = jnp.any(small, axis=-1, keepdims=True)             # (tm, 1)
    inv = jnp.where(small_any, jnp.zeros_like(d_x), 1.0 / d_x)
    inv = jnp.where(small, jnp.ones_like(inv), inv)
    dxw = inv * w                                                  # (tm, N1P); padded cols = 0

    den = jnp.sum(dxw, axis=-1, keepdims=True)                     # (tm, 1)
    inv_den = pl.reciprocal(den, approx=True)                      # EUP slot
    inv_den = inv_den * (2.0 - den * inv_den)                      # one Newton step -> ~f32 exact

    # out[i,j] = (sum_p dxw[i,p] * TC[p,j]) / den[i]   (1/den commutes with the dot)
    num = jnp.dot(dxw, tc_ref[...], preferred_element_type=jnp.float32,
                  precision=jax.lax.Precision.HIGHEST)             # (tm, tn)
    out_ref[...] = (num * inv_den).astype(out_ref.dtype)


def _fold_values(values, compute_dtype):
    """Fold the real-DFT analysis tables, symmetry weights and 1/N2 into the values.

    Returns (N1P, N2):  [values @ COS_TBL | values @ SIN_TBL], rows zero-padded 11 -> 16.
    """
    hi = jax.lax.Precision.HIGHEST
    v = values.astype(jnp.float32)
    t = jnp.concatenate(
        [jnp.dot(v, jnp.asarray(COS_TBL, jnp.float32), precision=hi),
         jnp.dot(v, jnp.asarray(SIN_TBL, jnp.float32), precision=hi)], axis=1)    # (N1, N2)
    t = jnp.pad(t, ((0, N1P - N1), (0, 0)))                                       # (N1P, N2)
    return t.astype(compute_dtype)


def spectral_interpolation_forward(values, x1, x2, *, tm=256, tn=512,
                                   compute_dtype=jnp.float32):
    """values: (N1, N2); x1: (m1,) cheb-dim eval pts; x2: (m2,) fourier-dim eval pts.

    tm: m1 tile (multiple of 8); tn: m2 tile (multiple of 128, lane-dense output).
    compute_dtype: dtype of the T @ cs MXU dot operands (f32 default; bf16 ~3x MXU).
    """
    m1, m2 = x1.shape[0], x2.shape[0]
    tm = _round_up(min(tm, _round_up(m1, 8)), 8)
    tn = _round_up(min(tn, _round_up(m2, 128)), 128)
    m1p, m2p = _round_up(m1, tm), _round_up(m2, tn)
    n_i, n_j = m1p // tm, m2p // tn

    # pad eval points with in-domain values (cheap; padded rows/cols sliced away)
    x1p = jnp.pad(x1.astype(jnp.float32), (0, m1p - m1),
                  constant_values=float(D0_LO)).reshape(m1p, 1)
    x2p = jnp.pad(x2.astype(jnp.float32), (0, m2p - m2),
                  constant_values=float(D1_LO)).reshape(1, m2p)
    t = _fold_values(values, compute_dtype)

    const = lambda j, i: (0, 0)     # constants: same block every grid step -> stay resident
    out = pl.pallas_call(
        spectral_interp_kernel,
        out_shape=jax.ShapeDtypeStruct((m1p, m2p), jnp.float32),
        grid=(n_j, n_i),
        in_specs=[
            pl.BlockSpec((tm, 1), lambda j, i: (i, 0)),            # x1 column tile
            pl.BlockSpec((1, tn), lambda j, i: (0, j)),            # x2 row tile
            pl.BlockSpec((1, N1P), const),                         # cheb nodes (padded)
            pl.BlockSpec((1, N1P), const),                         # cheb weights (padded)
            pl.BlockSpec((N2, 1), const),                          # folded frequencies
            pl.BlockSpec((N2, 1), const),                          # phase (0 | -pi/2)
            pl.BlockSpec((N1P, N2), const),                        # folded values table T
        ],
        out_specs=pl.BlockSpec((tm, tn), lambda j, i: (i, j)),
        scratch_shapes=[pltpu.VMEM((N1P, tn), jnp.float32)],       # per-m2-tile TC cache
        compiler_params=pltpu.CompilerParams(
            # m2 axis parallel (megacore sharding); m1 axis arbitrary so the
            # TC scratch computed at i == 0 is valid for every i of that m2 tile.
            dimension_semantics=("parallel", "arbitrary"),
            vmem_limit_bytes=32 * 1024 * 1024),
        cost_estimate=pl.CostEstimate(
            flops=int(2 * N1P * N2 * m2p + 2 * m1p * N1P * m2p),
            transcendentals=int(N2 * m2p),
            bytes_accessed=int(4 * (m1p * m2p + m1p + m2p + N1P * (N2 + 4) + 2 * N2))),
    )(
        x1p, x2p,
        jnp.asarray(NODES_PAD.reshape(1, N1P), jnp.float32),
        jnp.asarray(W_PAD.reshape(1, N1P), jnp.float32),
        jnp.asarray(K_FOLD),
        jnp.asarray(PHASE_FOLD),
        t,
    )
    return out[:m1, :m2]


def reference_forward(values, x1, x2):
    """Pure-JAX mirror of the PyTorch semantics (uses an actual FFT)."""
    hi = jax.lax.Precision.HIGHEST
    nodes = jnp.asarray(NODES_STD, jnp.float32)
    w = jnp.asarray(CHEB_W, jnp.float32)
    k = jnp.asarray(K_FFT, jnp.float32)

    x1s = 2.0 * (x1 - D0_LO) / D0_LEN - 1.0
    d_x = x1s[:, None] - nodes[None, :]
    small = jnp.abs(d_x) < EPS
    small_any = jnp.any(small, axis=-1, keepdims=True)
    d_x = jnp.where(small_any, 0.0, 1.0 / d_x)
    d_x = jnp.where(small, 1.0, d_x)
    dxw = d_x * w[None, :]
    s1 = jnp.dot(dxw, values, precision=hi) / dxw.sum(-1, keepdims=True)   # (m1, N2)

    x2s = 2.0 * jnp.pi * (x2 - D1_LO) / D1_LEN
    coeffs = jnp.fft.fft(s1, axis=-1)                                      # (m1, N2) complex
    fmat = jnp.exp(1j * x2s[:, None] * k[None, :])                         # (m2, N2)
    res = jnp.real(jnp.dot(fmat, coeffs.T, precision=hi)) / N2             # (m2, m1)
    return res.T                                                           # (m1, m2)


if __name__ == "__main__":
    key = jax.random.PRNGKey(0)
    kv, kx1, kx2 = jax.random.split(key, 3)

    # the module inits nn.Parameter(zeros(Ns)); use random values so the
    # interpolation is non-trivial.
    values = jax.random.normal(kv, (N1, N2), jnp.float32)

    m1, m2 = 24, 300
    x1 = jax.random.uniform(kx1, (m1,), jnp.float32, minval=D0_LO, maxval=D0_HI)
    x2 = jax.random.uniform(kx2, (m2,), jnp.float32, minval=D1_LO, maxval=D1_HI)

    # Small tiles so the demo exercises the 2-D grid, the per-m2-tile TC cache
    # (i > 0 reuse) and the pad/slice path: grid = (3, 3) here.  Production
    # defaults are tm=256, tn=512.
    out = spectral_interpolation_forward(values, x1, x2, tm=8, tn=128)
    out = jax.block_until_ready(out)

    ref = reference_forward(values, x1, x2)
    np.testing.assert_allclose(np.asarray(out), np.asarray(ref), rtol=5e-3, atol=5e-3)

    # Optional bf16-MXU path: ~3x MXU throughput on the T @ cs dot; loose sanity check.
    out_bf16 = spectral_interpolation_forward(values, x1, x2, tm=8, tn=128,
                                              compute_dtype=jnp.bfloat16)
    out_bf16 = jax.block_until_ready(out_bf16)
    np.testing.assert_allclose(np.asarray(out_bf16), np.asarray(ref), rtol=5e-2, atol=5e-2)

    print("KERNEL_OK")
</pallas_src>

<mosaic_0001>
module attributes {stable_mosaic.version = 11 : i64} {
  func.func @spectral_interp_kernel(%arg0: i32, %arg1: i32, %arg2: memref<8x1xf32, #tpu.memory_space<vmem>>, %arg3: memref<1x128xf32, #tpu.memory_space<vmem>>, %arg4: memref<1x16xf32, #tpu.memory_space<vmem>>, %arg5: memref<1x16xf32, #tpu.memory_space<vmem>>, %arg6: memref<80x1xf32, #tpu.memory_space<vmem>>, %arg7: memref<80x1xf32, #tpu.memory_space<vmem>>, %arg8: memref<16x80xf32, #tpu.memory_space<vmem>>, %arg9: memref<8x128xf32, #tpu.memory_space<vmem>>, %arg10: memref<16x128xf32, #tpu.memory_space<vmem>>) attributes {dimension_semantics = [#tpu.dimension_semantics<parallel>, #tpu.dimension_semantics<arbitrary>], iteration_bounds = array<i64: 3, 3>, scalar_prefetch = 0 : i64, scratch_operands = 1 : i64, tpu.core_type = #tpu.core_type<tc>, window_params = [{transform_indices = @transform_0, window_bounds = array<i64: 8, 1>}, {transform_indices = @transform_1, window_bounds = array<i64: 1, 128>}, {pipeline_mode = #tpu.pipeline_mode<synchronous>, transform_indices = @transform_2, window_bounds = array<i64: 1, 16>}, {pipeline_mode = #tpu.pipeline_mode<synchronous>, transform_indices = @transform_3, window_bounds = array<i64: 1, 16>}, {pipeline_mode = #tpu.pipeline_mode<synchronous>, transform_indices = @transform_4, window_bounds = array<i64: 80, 1>}, {pipeline_mode = #tpu.pipeline_mode<synchronous>, transform_indices = @transform_5, window_bounds = array<i64: 80, 1>}, {pipeline_mode = #tpu.pipeline_mode<synchronous>, transform_indices = @transform_6, window_bounds = array<i64: 16, 80>}, {transform_indices = @transform_7, window_bounds = array<i64: 8, 128>}]} {
    %c0_i32 = arith.constant 0 : i32
    %0 = arith.cmpi eq, %arg1, %c0_i32 : i32
    %1 = arith.extui %0 : i1 to i32
    %c0_i32_0 = arith.constant 0 : i32
    %2 = arith.cmpi ne, %1, %c0_i32_0 : i32
    scf.if %2 {
      %c0_24 = arith.constant 0 : index
      %c0_25 = arith.constant 0 : index
      %49 = vector.load %arg3[%c0_24, %c0_25] : memref<1x128xf32, #tpu.memory_space<vmem>>, vector<1x128xf32>
      %cst_26 = arith.constant 0.000000e+00 : f32
      %50 = vector.broadcast %cst_26 : f32 to vector<1x128xf32>
      %51 = arith.subf %49, %50 : vector<1x128xf32>
      %cst_27 = arith.constant 6.28318548 : f32
      %52 = vector.broadcast %cst_27 : f32 to vector<1x128xf32>
      %53 = arith.mulf %52, %51 : vector<1x128xf32>
      %cst_28 = arith.constant 6.28318548 : f32
      %54 = vector.broadcast %cst_28 : f32 to vector<1x128xf32>
      %55 = arith.divf %53, %54 : vector<1x128xf32>
      %c0_29 = arith.constant 0 : index
      %c0_30 = arith.constant 0 : index
      %56 = vector.load %arg6[%c0_29, %c0_30] : memref<80x1xf32, #tpu.memory_space<vmem>>, vector<80x1xf32>
      %57 = vector.broadcast %56 : vector<80x1xf32> to vector<80x128xf32>
      %58 = vector.broadcast %55 : vector<1x128xf32> to vector<80x128xf32>
      %59 = arith.mulf %57, %58 : vector<80x128xf32>
      %c0_31 = arith.constant 0 : index
      %c0_32 = arith.constant 0 : index
      %60 = vector.load %arg7[%c0_31, %c0_32] : memref<80x1xf32, #tpu.memory_space<vmem>>, vector<80x1xf32>
      %61 = vector.broadcast %60 : vector<80x1xf32> to vector<80x128xf32>
      %62 = arith.addf %59, %61 : vector<80x128xf32>
      %63 = math.cos %62 : vector<80x128xf32>
      %c0_33 = arith.constant 0 : index
      %c0_34 = arith.constant 0 : index
      %64 = vector.load %arg8[%c0_33, %c0_34] : memref<16x80xf32, #tpu.memory_space<vmem>>, vector<16x80xf32>
      %cst_35 = arith.constant dense<0.000000e+00> : vector<16x128xf32>
      %65 = tpu.matmul %64, %63, %cst_35 {dimension_numbers = #tpu.dot_dimension_numbers<[1], [0], [0], [1], [0, 0, 1, 1], [], []>, precision = #tpu.contract_precision<fp32>} : vector<16x80xf32>, vector<80x128xf32>, vector<16x128xf32> -> vector<16x128xf32>
      %c0_36 = arith.constant 0 : index
      %c0_37 = arith.constant 0 : index
      %66 = vector.load %arg10[%c0_36, %c0_37] : memref<16x128xf32, #tpu.memory_space<vmem>>, vector<16x128xf32>
      tpu.vector_store %arg10[%c0_36, %c0_37], %65 {strides = array<i32>} : memref<16x128xf32, #tpu.memory_space<vmem>>, vector<16x128xf32>,
    } else {
    }
    %c0 = arith.constant 0 : index
    %c0_1 = arith.constant 0 : index
    %3 = vector.load %arg2[%c0, %c0_1] : memref<8x1xf32, #tpu.memory_space<vmem>>, vector<8x1xf32>
    %c0_2 = arith.constant 0 : index
    %c0_3 = arith.constant 0 : index
    %4 = vector.load %arg4[%c0_2, %c0_3] : memref<1x16xf32, #tpu.memory_space<vmem>>, vector<1x16xf32>
    %c0_4 = arith.constant 0 : index
    %c0_5 = arith.constant 0 : index
    %5 = vector.load %arg5[%c0_4, %c0_5] : memref<1x16xf32, #tpu.memory_space<vmem>>, vector<1x16xf32>
    %cst = arith.constant 0.000000e+00 : f32
    %6 = vector.broadcast %cst : f32 to vector<8x1xf32>
    %7 = arith.subf %3, %6 : vector<8x1xf32>
    %cst_6 = arith.constant 2.000000e+00 : f32
    %8 = vector.broadcast %cst_6 : f32 to vector<8x1xf32>
    %9 = arith.mulf %8, %7 : vector<8x1xf32>
    %cst_7 = arith.constant 0.00999999977 : f32
    %10 = vector.broadcast %cst_7 : f32 to vector<8x1xf32>
    %11 = arith.divf %9, %10 : vector<8x1xf32>
    %cst_8 = arith.constant 1.000000e+00 : f32
    %12 = vector.broadcast %cst_8 : f32 to vector<8x1xf32>
    %13 = arith.subf %11, %12 : vector<8x1xf32>
    %14 = vector.broadcast %13 : vector<8x1xf32> to vector<8x16xf32>
    %15 = vector.broadcast %4 : vector<1x16xf32> to vector<8x16xf32>
    %16 = arith.subf %14, %15 : vector<8x16xf32>
    %17 = math.absf %16 : vector<8x16xf32>
    %cst_9 = arith.constant 9.99999982E-15 : f32
    %18 = vector.broadcast %cst_9 : f32 to vector<8x16xf32>
    %19 = arith.cmpf olt, %17, %18 : vector<8x16xf32>
    %cst_10 = arith.constant 1.000000e+00 : f32
    %cst_11 = arith.constant 0.000000e+00 : f32
    %20 = vector.broadcast %cst_10 : f32 to vector<8x16xf32>
    %21 = vector.broadcast %cst_11 : f32 to vector<8x16xf32>
    %22 = arith.select %19, %20, %21 : vector<8x16xi1>, vector<8x16xf32>
    %cst_12 = arith.constant dense<0xFF800000> : vector<8xf32>
    %23 = vector.multi_reduction <maximumf>, %22, %cst_12 [1] : vector<8x16xf32> to vector<8xf32>
    %cst_13 = arith.constant 0.000000e+00 : f32
    %24 = vector.broadcast %cst_13 : f32 to vector<8xf32>
    %25 = arith.cmpf ogt, %23, %24 : vector<8xf32>
    %26 = vector.shape_cast %25 : vector<8xi1> to vector<8x1xi1>
    %cst_14 = arith.constant 0.000000e+00 : f32
    %27 = vector.broadcast %cst_14 : f32 to vector<8x16xf32>
    %cst_15 = arith.constant 1.000000e+00 : f32
    %28 = vector.broadcast %cst_15 : f32 to vector<8x16xf32>
    %29 = arith.divf %28, %16 : vector<8x16xf32>
    %30 = vector.shape_cast %26 : vector<8x1xi1> to vector<8x1xi1>
    %31 = vector.broadcast %30 : vector<8x1xi1> to vector<8x16xi1>
    %32 = arith.select %31, %27, %29 : vector<8x16xi1>, vector<8x16xf32>
    %cst_16 = arith.constant 1.000000e+00 : f32
    %33 = vector.broadcast %cst_16 : f32 to vector<8x16xf32>
    %34 = arith.select %19, %33, %32 : vector<8x16xi1>, vector<8x16xf32>
    %35 = vector.broadcast %5 : vector<1x16xf32> to vector<8x16xf32>
    %36 = arith.mulf %34, %35 : vector<8x16xf32>
    %cst_17 = arith.constant dense<0.000000e+00> : vector<8xf32>
    %37 = vector.multi_reduction <add>, %36, %cst_17 [1] : vector<8x16xf32> to vector<8xf32>
    %38 = vector.shape_cast %37 : vector<8xf32> to vector<8x1xf32>
    %39 = tpu.reciprocal %38 {approx = true} : vector<8x1xf32> -> vector<8x1xf32>
    %40 = arith.mulf %38, %39 : vector<8x1xf32>
    %cst_18 = arith.constant 2.000000e+00 : f32
    %41 = vector.broadcast %cst_18 : f32 to vector<8x1xf32>
    %42 = arith.subf %41, %40 : vector<8x1xf32>
    %43 = arith.mulf %39, %42 : vector<8x1xf32>
    %c0_19 = arith.constant 0 : index
    %c0_20 = arith.constant 0 : index
    %44 = vector.load %arg10[%c0_19, %c0_20] : memref<16x128xf32, #tpu.memory_space<vmem>>, vector<16x128xf32>
    %cst_21 = arith.constant dense<0.000000e+00> : vector<8x128xf32>
    %45 = tpu.matmul %36, %44, %cst_21 {dimension_numbers = #tpu.dot_dimension_numbers<[1], [0], [0], [1], [0, 0, 1, 1], [], []>, precision = #tpu.contract_precision<fp32>} : vector<8x16xf32>, vector<16x128xf32>, vector<8x128xf32> -> vector<8x128xf32>
    %46 = vector.broadcast %43 : vector<8x1xf32> to vector<8x128xf32>
    %47 = arith.mulf %45, %46 : vector<8x128xf32>
    %c0_22 = arith.constant 0 : index
    %c0_23 = arith.constant 0 : index
    %48 = vector.load %arg9[%c0_22, %c0_23] : memref<8x128xf32, #tpu.memory_space<vmem>>, vector<8x128xf32>
    tpu.vector_store %arg9[%c0_22, %c0_23], %47 {strides = array<i32>} : memref<8x128xf32, #tpu.memory_space<vmem>>, vector<8x128xf32>,
    return
  }
  func.func @transform_0(%arg0: i32, %arg1: i32) -> (i32, i32) {
    %c0_i32 = arith.constant 0 : i32
    %c0_i32_0 = arith.constant 0 : i32
    return %arg1, %c0_i32 : i32, i32
  }
  func.func @transform_1(%arg0: i32, %arg1: i32) -> (i32, i32) {
    %c0_i32 = arith.constant 0 : i32
    %c0_i32_0 = arith.constant 0 : i32
    return %c0_i32, %arg0 : i32, i32
  }
  func.func @transform_2(%arg0: i32, %arg1: i32) -> (i32, i32) {
    %c0_i32 = arith.constant 0 : i32
    %c0_i32_0 = arith.constant 0 : i32
    %c0_i32_1 = arith.constant 0 : i32
    return %c0_i32, %c0_i32_0 : i32, i32
  }
  func.func @transform_3(%arg0: i32, %arg1: i32) -> (i32, i32) {
    %c0_i32 = arith.constant 0 : i32
    %c0_i32_0 = arith.constant 0 : i32
    %c0_i32_1 = arith.constant 0 : i32
    return %c0_i32, %c0_i32_0 : i32, i32
  }
  func.func @transform_4(%arg0: i32, %arg1: i32) -> (i32, i32) {
    %c0_i32 = arith.constant 0 : i32
    %c0_i32_0 = arith.constant 0 : i32
    %c0_i32_1 = arith.constant 0 : i32
    return %c0_i32, %c0_i32_0 : i32, i32
  }
  func.func @transform_5(%arg0: i32, %arg1: i32) -> (i32, i32) {
    %c0_i32 = arith.constant 0 : i32
    %c0_i32_0 = arith.constant 0 : i32
    %c0_i32_1 = arith.constant 0 : i32
    return %c0_i32, %c0_i32_0 : i32, i32
  }
  func.func @transform_6(%arg0: i32, %arg1: i32) -> (i32, i32) {
    %c0_i32 = arith.constant 0 : i32
    %c0_i32_0 = arith.constant 0 : i32
    %c0_i32_1 = arith.constant 0 : i32
    return %c0_i32, %c0_i32_0 : i32, i32
  }
  func.func @transform_7(%arg0: i32, %arg1: i32) -> (i32, i32) {
    %c0_i32 = arith.constant 0 : i32
    return %arg1, %arg0 : i32, i32
  }
}

</mosaic_0001>

<bundles_post_ra>
// kernel: tpu_custom_call.1
= control target key start
LH: loop header
LB: loop body
LE: loop exit
PB: predicated region body
PF: predicated region fallthrough
CT: control target
= control target key end

     0   :  { %12 = vsyncpa [#allocation4], 0  ;;  %s4768_s0 = inlined_call_operand.vmem [shape: f32[24,1], index: 0, kind: input, shape index: {}]   ;;  %s4769_s1 = inlined_call_operand.vmem [shape: f32[1,384], index: 1, kind: input, shape index: {}]   ;;  %s4770_s2 = inlined_call_operand.vmem [shape: f32[1,16], index: 2, kind: input, shape index: {}]   ;;  %s4771_s3 = inlined_call_operand.vmem [shape: f32[1,16], index: 3, kind: input, shape index: {}]   ;;  %s4772_s4 = inlined_call_operand.vmem [shape: f32[80,1], index: 4, kind: input, shape index: {}]   ;;  %s4773_s5 = inlined_call_operand.vmem [shape: f32[80,1], index: 5, kind: input, shape index: {}]   ;;  %s4774_s6 = inlined_call_operand.vmem [shape: f32[16,80], index: 6, kind: input, shape index: {}]   ;;  %s4775_s7 = inlined_call_operand.hbm [shape: f32[24,384], index: 7, kind: output, shape index: {}]  }
   0x1   :  { %14 = vsyncpa [#allocation4 + $0x1], 0  ;;  %s3513_s24 = smov 0   ;;  %s3515_s25 = smov 0  }
   0x2   :  { %s3517_s26 = smov 0   ;;  %s3519_s27 = smov 0  }
   0x3   :  { %s3521_s28 = smov 0   ;;  %s3523_s29 = smov 0  }
   0x4   :  { %s3525_s30 = smov 0   ;;  %s3527_s8 = smov 0  }
   0x5 LB: > { %4781 = sst [smem:[#allocation6_spill]] %s3451_s29  ;;  %s2713_s9 = sadd.s32 4294967295, %s3459_s8   ;;  %s3459_s8 = sphi %s3527_s8, %s20_s8   ;;  %s3455_s30 = sphi %s3525_s30, %s4815_s30   ;;  %s3451_s29 = sphi %s3523_s29, %s4814_s29   ;;  %s3447_s28 = sphi %s3521_s28, %s4813_s28   ;;  %s3443_s27 = sphi %s3519_s27, %s4812_s27   ;;  %s3439_s26 = sphi %s3517_s26, %s4818_s26   ;;  %s3435_s25 = sphi %s3515_s25, %s4817_s25   ;;  %s3431_s24 = sphi %s3513_s24, %s4816_s24  }
   0x6   : > { %4782 = sst [smem:[#allocation7_spill]] %s3455_s30  ;;  %s2714_s10 = sadd.s32 4294967294, %s3459_s8  }
   0x7   : > { %s29_s11 = sadd.s32 1, %s3451_s29  ;;  %s32_s12 = sadd.s32 1, %s3455_s30 }
   0x8   : > { %p30_p0 = scmp.ge.s32.totalorder %s29_s11, 3  ;;  %p208_p1 = scmp.ne.s32.totalorder %s3439_s26, %s3435_s25 }
   0x9   : > { %p209_p2 = scmp.eq.s32.totalorder %s2713_s9, 8  ;;  %p214_p5 = scmp.ne.s32.totalorder %s3435_s25, %s3431_s24 }
   0xa   : > { %s4820_s11 = smov (%p30_p0, %s29_s11), 0  ;;  %s4822_s12 = smov (!%p30_p0, %s32_s12), %s3455_s30 }
   0xb   : > { %4783 = sst [smem:[#allocation8_spill]] %s4820_s11  ;;  %s193_s13 = ssub.s32 %s3451_s29, %s4820_s11 }
   0xc   : > { %p3564_p3 = por %p209_p2, %p208_p1  ;;  %p34_p4 = scmp.ge.s32.totalorder %s4822_s12, 3 }
   0xd   : > { %p215_p6 = scmp.eq.s32.totalorder %s2714_s10, 8  ;;  %p2717_p7 = scmp.ge.s32.totalorder %s3459_s8, 1 }
   0xe   : > { %s4824_s12 = smov (%p34_p4, %s4822_s12), 0  ;;  %p261_p9 = scmp.lt.s32.totalorder %s3459_s8, 10 }
   0xf   : > { %4785 = sst [smem:[#allocation9_spill]] %s4824_s12  ;;  %p3573_p8 = por %p215_p6, %p214_p5 }
  0x10   : > { %s194_s16 = ssub.s32 %s3455_s30, %s4824_s12  ;;  %s198_s17 = sadd.s32 1, %s3439_s26 }
  0x11   : > { %s195_s18 = sor.u32 %s194_s16, %s193_s13  ;;  %p262_p10 = pnand %p2717_p7, %p261_p9 }
  0x12   : > { %p196_p11 = scmp.eq.s32.totalorder %s195_s18, 0  ;;  %s4778_s20 = sand.u32 (!%p262_p10), 1, %s3435_s25  }
  0x13   : > { %265 = sbr.rel (%p262_p10) target bundleno = 1265 (0x4f1), region = 48  ;;  %p295_p12 = scmp.lt.s32.totalorder (!%p262_p10), %s3443_s27, 2 }
  0x14   : > { %s3582_s19 = scalar_select %p196_p11, %s3439_s26, %s198_s17  }
  0x15   : > { %s3588_s21 = sshll.u32 (!%p262_p10), %s4778_s20, 3  ;;  %p299_p13 = scmp.lt.s32.totalorder (!%p262_p10), %s3447_s28, 2 }
  0x16   : > { %4787 = sst [smem:[#allocation10_spill]] %s3582_s19  ;;  %s294_s11 = scalar_lea.vmem (!%p262_p10), [#allocation3], %s3588_s21 }
  0x17   : > { %p2720_p0 = scmp.ne.s32.totalorder (!%p262_p10), %s3443_s27, 0 }
  0x1a   : > { %s296_s22 = scalar_select %p295_p12, %s3443_s27, 2 }
  0x1b   : > { %s3593_s23 = scalar_select %p299_p13, %s3447_s28, 2 }
  0x1c   : > { %s2719_s9 = sshll.u32 %s296_s22, 3  ;;  %305 = sbr.rel (%p2720_p0) target bundleno = 719 (0x2cf), region = 52  ;;  %v386_v0 = vld [vmem:[%s4773_s5] sm:$0xff] (!%p2720_p0)  ;;  %v3461_v2 = vmov (!%p2720_p0), 0   ;;  %v387_v3 = vld [vmem:[%s4773_s5 + $0x8] sm:$0xff] (!%p2720_p0)  ;;  %v313_v5 = vld [vmem:[%s4772_s4 + $0x18] sm:$0xff] (!%p2720_p0)  ;;  %v371_v21 = vlaneseq (!%p2720_p0) }
  0x1d   : > { %s3598_s16 = scalar_lea.vmem %s4768_s0, %s2719_s9  ;;  %s301_s12 = scalar_lea.vmem %s4769_s1, %s3593_s23  ;;  %v310_v1 = vld [vmem:[%s4772_s4] sm:$0xff] (!%p2720_p0)  ;;  %3319 = vset.pattern.permute.xlu1 (!%p2720_p0), %v3461_v2  ;;  %3318 = vset.pattern.permute.xlu0 (!%p2720_p0), %v3461_v2  ;;  %v311_v4 = vld [vmem:[%s4772_s4 + $0x8] sm:$0xff] (!%p2720_p0)  ;;  %v312_v6 = vld [vmem:[%s4772_s4 + $0x10] sm:$0xff] (!%p2720_p0)  ;;  %v3462_v58 = vmov (!%p2720_p0), 683565275  }
  0x1e   : > { %398 = vperm.xlu1 (!%p2720_p0), %3319, %v386_v0   ;;  %322 = vperm.xlu0 (!%p2720_p0), %3318, %v310_v1   ;;  %v389_v7 = vld [vmem:[%s4773_s5 + $0x18] sm:$0xff] (!%p2720_p0)  ;;  %v388_v8 = vld [vmem:[%s4773_s5 + $0x10] sm:$0xff] (!%p2720_p0)  ;;  %v315_v9 = vld [vmem:[%s4772_s4 + $0x28] sm:$0xff] (!%p2720_p0)  ;;  %v372_v23 = vshrl.u32 (!%p2720_p0), %v371_v21, 7  ;;  %v3463_v60 = vmov (!%p2720_p0), 2475754826  }
  0x1f   : > { %v314_v10 = vld [vmem:[%s4772_s4 + $0x20] sm:$0xff] (!%p2720_p0)  ;;  %v391_v11 = vld [vmem:[%s4773_s5 + $0x28] sm:$0xff] (!%p2720_p0)  ;;  %v317_v13 = vld [vmem:[%s4772_s4 + $0x38] sm:$0xff] (!%p2720_p0)  ;;  %v3464_v63 = vmov (!%p2720_p0), 2131351028  }
  0x20   : > { %v390_v12 = vld [vmem:[%s4773_s5 + $0x20] sm:$0xff] (!%p2720_p0)  ;;  %v316_v14 = vld [vmem:[%s4772_s4 + $0x30] sm:$0xff] (!%p2720_p0)  ;;  %v393_v15 = vld [vmem:[%s4773_s5 + $0x38] sm:$0xff] (!%p2720_p0)  ;;  %v373_v25 = vsub.s32 (!%p2720_p0), 0, %v372_v23  ;;  %v3465_v1 = vmov (!%p2720_p0), 2102212464  }
  0x21   : > { %v392_v16 = vld [vmem:[%s4773_s5 + $0x30] sm:$0xff] (!%p2720_p0)  ;;  %v319_v17 = vld [vmem:[%s4772_s4 + $0x48] sm:$0xff] (!%p2720_p0)  ;;  %v318_v18 = vld [vmem:[%s4772_s4 + $0x40] sm:$0xff] (!%p2720_p0) }
  0x22   : > { %403 = vperm.xlu1 (!%p2720_p0), %3319, %v387_v3   ;;  %327 = vperm.xlu0 (!%p2720_p0), %3318, %v311_v4   ;;  %v395_v19 = vld [vmem:[%s4773_s5 + $0x48] sm:$0xff] (!%p2720_p0)  ;;  %v394_v20 = vld [vmem:[%s4773_s5 + $0x40] sm:$0xff] (!%p2720_p0)  ;;  %v3466_v3 = vmov (!%p2720_p0), 920167782  }
  0x23   : > { %v306_v22 = vld [vmem:[%s301_s12] sm:$0x1] }
  0x24   : > { %v307_v24 = vmul.f32 6.2831855, %v306_v22 }
  0x26   : > { %337 = vperm.xlu1 %3319, %v313_v5   ;;  %332 = vperm.xlu0 %3318, %v312_v6   ;;  %v309_v26 = vmul.f32 0.15915494, %v307_v24 }
  0x28   : > { %v3671_v27 = vrot.slane %v309_v26, %v373_v25 }
  0x2a   : > { %413 = vperm.xlu1 %3319, %v389_v7   ;;  %408 = vperm.xlu0 %3318, %v388_v8  }
  0x2e   : > { %347 = vperm.xlu1 %3319, %v315_v9   ;;  %342 = vperm.xlu0 %3318, %v314_v10   ;;  %v3467_v10 = vmov 1326507024  }
  0x32   : > { %423 = vperm.xlu1 %3319, %v391_v11   ;;  %418 = vperm.xlu0 %3318, %v390_v12  }
  0x36   : > { %357 = vperm.xlu1 %3319, %v317_v13   ;;  %352 = vperm.xlu0 %3318, %v316_v14  }
  0x3a   : > { %433 = vperm.xlu1 %3319, %v393_v15   ;;  %428 = vperm.xlu0 %3318, %v392_v16  }
  0x3e   : > { %367 = vperm.xlu1 %3319, %v319_v17   ;;  %362 = vperm.xlu0 %3318, %v318_v18  }
  0x42   : > { %443 = vperm.xlu1 %3319, %v395_v19   ;;  %438 = vperm.xlu0 %3318, %v394_v20  }
  0x9d   : > { %v399_v28 = vpop.permute.xlu1 %398  ;;  %v323_v29 = vpop.permute.xlu0 %322 }
  0x9e   : > { %v376_v30 = vmul.f32 %v3671_v27, %v323_v29 }
  0xa0   : > { %v3674_v31 = vadd.f32 %v399_v28, %v376_v30 }
  0xa1   : > { %v404_v32 = vpop.permute.xlu1 %403  ;;  %v328_v33 = vpop.permute.xlu0 %327 }
  0xa2   : > { %v456_v34 = vand.u32 2147483647, %v3674_v31  ;;  %v459_v35 = vand.u32 2139095040, %v3674_v31  ;;  %v377_v36 = vmul.f32 %v3671_v27, %v328_v33 }
  0xa4   : > { %v460_v37 = vshrl.u32 %v459_v35, 23  ;;  %v463_v38 = vand.u32 8388607, %v456_v34  ;;  %v3681_v39 = vadd.f32 %v404_v32, %v377_v36 }
  0xa5   : > { %v338_v40 = vpop.permute.xlu1 %337 }
  0xa6   : > { %v2721_v41 = vadd.s32 4294967169, %v460_v37  ;;  %v559_v42 = vand.u32 2147483647, %v3681_v39  ;;  %v562_v43 = vand.u32 2139095040, %v3681_v39  ;;  %v464_v45 = vor.u32 8388608, %v463_v38 }
  0xa7   : > { %v379_v51 = vmul.f32 %v3671_v27, %v338_v40 }
  0xa8   : > { %v466_v44 = vadd.s32 1, %v2721_v41  ;;  %v563_v46 = vshrl.u32 %v562_v43, 23  ;;  %v566_v47 = vand.u32 8388607, %v559_v42  ;;  %v3688_v54 = vshll.u32 %v464_v45, 8 }
  0xa9   : > { %v414_v48 = vpop.permute.xlu1 %413 }
  0xaa   : > { %vm467_vm0 = vcmp.gt.s32.totalorder %v466_v44, 0  ;;  %v2725_v50 = vadd.s32 4294967169, %v563_v46  ;;  %v567_v55 = vor.u32 8388608, %v566_v47  ;;  %v3690_v56 = vadd.f32 %v414_v48, %v379_v51 }
  0xab   : > { %v468_v49 = vsel %vm467_vm0, %v466_v44, 0 }
  0xac   : > { %v469_v52 = vshrl.u32 %v468_v49, 5  ;;  %v470_v53 = vand.u32 31, %v468_v49  ;;  %v569_v62 = vadd.s32 1, %v2725_v50  ;;  %v3712_v35 = vshll.u32 %v567_v55, 8 }
  0xad   : > { %v768_v44 = vand.u32 2139095040, %v3690_v56 }
  0xae   : > { %v471_v57 = vsub.s32 32, %v470_v53  ;;  %v473_v59 = vshll.u32 %v3462_v58, %v470_v53  ;;  %v476_v61 = vshll.u32 %v3463_v60, %v470_v53  ;;  %v479_v0 = vshll.u32 %v3464_v63, %v470_v53 }
  0xaf   : > { %v482_v2 = vshll.u32 %v3465_v1, %v470_v53  ;;  %v485_v4 = vshll.u32 %v3466_v3, %v470_v53  ;;  %vm488_vm1 = vcmp.lt.s32.totalorder %v469_v52, 1  ;;  %vm489_vm2 = vcmp.lt.s32.totalorder %v469_v52, 2 }
  0xb0   : > { %v474_v5 = vshrl.u32 %v3463_v60, %v471_v57  ;;  %v477_v6 = vshrl.u32 %v3464_v63, %v471_v57  ;;  %v480_v7 = vshrl.u32 %v3465_v1, %v471_v57  ;;  %v472_v8 = vshrl.u32 %v3462_v58, %v471_v57 }
  0xb1   : > { %v483_v9 = vshrl.u32 %v3466_v3, %v471_v57  ;;  %v486_v11 = vshrl.u32 %v3467_v10, %v471_v57  ;;  %vm490_vm3 = vcmp.lt.s32.totalorder %v469_v52, 3  ;;  %vm570_vm4 = vcmp.gt.s32.totalorder %v569_v62, 0 }
  0xb2   : > { %v475_v12 = vor.u32 %v474_v5, %v473_v59  ;;  %v478_v13 = vor.u32 %v477_v6, %v476_v61  ;;  %v481_v14 = vor.u32 %v480_v7, %v479_v0  ;;  %vm491_vm5 = vcmp.lt.s32.totalorder %v469_v52, 4 }
  0xb3   : > { %v484_v15 = vor.u32 %v483_v9, %v482_v2  ;;  %v487_v16 = vor.u32 %v486_v11, %v485_v4  ;;  %v571_v17 = vsel %vm570_vm4, %v569_v62, 0  ;;  %v769_v2 = vshrl.u32 %v768_v44, 23 }
  0xb4   : > { %v492_v18 = vsel %vm488_vm1, %v472_v8, %v475_v12  ;;  %v493_v19 = vsel %vm491_vm5, %v481_v14, 2102212464  ;;  %v496_v20 = vsel %vm488_vm1, %v475_v12, %v478_v13  ;;  %v500_v21 = vsel %vm488_vm1, %v478_v13, %v481_v14 }
  0xb5   : > { %v494_v22 = vsel %vm490_vm3, %v478_v13, %v493_v19  ;;  %v497_v23 = vsel %vm491_vm5, %v484_v15, 920167782  ;;  %v501_v24 = vsel %vm491_vm5, %v487_v16, 1326507024  ;;  %v572_v25 = vshrl.u32 %v571_v17, 5 }
  0xb6   : > { %v495_v26 = vsel %vm489_vm2, %v492_v18, %v494_v22  ;;  %v498_v28 = vsel %vm490_vm3, %v481_v14, %v497_v23  ;;  %v502_v29 = vsel %vm490_vm3, %v484_v15, %v501_v24  ;;  %v573_v30 = vand.u32 31, %v571_v17 }
  0xb7   : > { %v499_v32 = vsel %vm489_vm2, %v496_v20, %v498_v28  ;;  %v503_v33 = vsel %vm489_vm2, %v500_v21, %v502_v29  ;;  %v511_v41 = vmul.u32 %v3688_v54, %v495_v26  ;;  %vm591_vm6 = vcmp.lt.s32.totalorder %v572_v25, 1  ;;  %v333_v28 = vpop.permute.xlu0 %332 }
  0xb8   : > { %v3715_v36 = vmul.u32.u64.low %v3688_v54, %v503_v33  ;;  %v3716_v37 = vmul.u32.u64.high %v3688_v54, %v503_v33, %v3715_v36  ;;  %v3719_v38 = vmul.u32.u64.low %v3688_v54, %v499_v32  ;;  %v3720_v40 = vmul.u32.u64.high %v3688_v54, %v499_v32, %v3719_v38 }
  0xb9   : > { %v574_v43 = vsub.s32 32, %v573_v30  ;;  %v576_v45 = vshll.u32 %v3462_v58, %v573_v30  ;;  %v579_v46 = vshll.u32 %v3463_v60, %v573_v30  ;;  %v582_v47 = vshll.u32 %v3464_v63, %v573_v30 }
  0xba   : > { %v585_v48 = vshll.u32 %v3465_v1, %v573_v30  ;;  %v588_v52 = vshll.u32 %v3466_v3, %v573_v30  ;;  %vm513_vm7 = vc.u32 %v3716_v37, %v3719_v38  ;;  %v514_v53 = vadd.s32 1, %v3720_v40 }
  0xbb   : > { %v577_v49 = vshrl.u32 %v3463_v60, %v574_v43  ;;  %v580_v50 = vshrl.u32 %v3464_v63, %v574_v43  ;;  %v583_v51 = vshrl.u32 %v3465_v1, %v574_v43  ;;  %v586_v54 = vshrl.u32 %v3466_v3, %v574_v43 }
  0xbc   : > { %vm592_vm8 = vcmp.lt.s32.totalorder %v572_v25, 2  ;;  %v589_v61 = vshrl.u32 %v3467_v10, %v574_v43  ;;  %v515_v62 = vsel %vm513_vm7, %v514_v53, %v3720_v40  ;;  %vm594_vm9 = vcmp.lt.s32.totalorder %v572_v25, 4 }
  0xbd   : > { %v578_v55 = vor.u32 %v577_v49, %v576_v45  ;;  %v581_v57 = vor.u32 %v580_v50, %v579_v46  ;;  %v584_v59 = vor.u32 %v583_v51, %v582_v47  ;;  %v587_v0 = vor.u32 %v586_v54, %v585_v48  ;;  %v409_v47 = vpop.permute.xlu0 %408 }
  0xbe   : > { %v516_v4 = vadd.s32 %v515_v62, %v511_v41  ;;  %v575_v5 = vshrl.u32 %v3462_v58, %v574_v43  ;;  %v590_v6 = vor.u32 %v589_v61, %v588_v52  ;;  %vm593_vm10 = vcmp.lt.s32.totalorder %v572_v25, 3 }
  0xbf   : > { %v596_v7 = vsel %vm594_vm9, %v584_v59, 2102212464  ;;  %v599_v8 = vsel %vm591_vm6, %v578_v55, %v581_v57  ;;  %v600_v9 = vsel %vm594_vm9, %v587_v0, 920167782  ;;  %v603_v11 = vsel %vm591_vm6, %v581_v57, %v584_v59 }
  0xc0   : > { %v517_v12 = vadd.s32 536870912, %v516_v4  ;;  %v595_v13 = vsel %vm591_vm6, %v575_v5, %v578_v55  ;;  %v601_v14 = vsel %vm593_vm10, %v584_v59, %v600_v9  ;;  %v604_v15 = vsel %vm594_vm9, %v590_v6, 1326507024 }
  0xc1   : > { %v597_v16 = vsel %vm593_vm10, %v581_v57, %v596_v7  ;;  %v602_v17 = vsel %vm592_vm8, %v599_v8, %v601_v14  ;;  %v605_v18 = vsel %vm593_vm10, %v587_v0, %v604_v15  ;;  %v2733_v19 = vadd.s32 4294967169, %v769_v2 }
  0xc2   : > { %v3744_v20 = vshrl.u32 %v517_v12, 30  ;;  %v606_v21 = vsel %vm592_vm8, %v603_v11, %v605_v18  ;;  %v3748_v22 = vmul.u32.u64.low %v3712_v35, %v602_v17  ;;  %v3749_v23 = vmul.u32.u64.high %v3712_v35, %v602_v17, %v3748_v22 }
  0xc3   : > { %v3753_v24 = vmul.u32.u64.low %v3712_v35, %v606_v21  ;;  %v3754_v26 = vmul.u32.u64.high %v3712_v35, %v606_v21, %v3753_v24  ;;  %v775_v29 = vadd.s32 1, %v2733_v19  ;;  %v598_v32 = vsel %vm592_vm8, %v595_v13, %v597_v16 }
  0xc4   : > { %v519_v30 = vshll.u32 %v3744_v20, 30  ;;  %v617_v36 = vadd.s32 1, %v3749_v23  ;;  %v614_v41 = vmul.u32 %v3712_v35, %v598_v32  ;;  %v765_v25 = vand.u32 2147483647, %v3690_v56 }
  0xc5   : > { %vm776_vm11 = vcmp.gt.s32.totalorder %v775_v29, 0  ;;  %vm616_vm12 = vc.u32 %v3754_v26, %v3748_v22  ;;  %v378_v49 = vmul.f32 %v3671_v27, %v333_v28  ;;  %v512_v53 = vadd.s32 %v3719_v38, %v3716_v37 }
  0xc6   : > { %v3758_v33 = vsub.s32 %v516_v4, %v519_v30  ;;  %v777_v40 = vsel %vm776_vm11, %v775_v29, 0  ;;  %v618_v44 = vsel %vm616_vm12, %v617_v36, %v3749_v23  ;;  %v772_v55 = vand.u32 8388607, %v765_v25 }
  0xc7   : > { %v779_v45 = vand.u32 31, %v777_v40  ;;  %v619_v46 = vadd.s32 %v618_v44, %v614_v41  ;;  %v3769_v35 = vadd.f32 %v409_v47, %v378_v49  ;;  %v3778_v61 = vshrl.u32 %v777_v40, 5 }
  0xc8   : > { %v522_v43 = vsub.s32 0, %v3758_v33  ;;  %v773_v18 = vor.u32 8388608, %v772_v55  ;;  %vm458_vm5 = vcmp.lt.s32.totalorder %v3674_v31, 0  ;;  %vm3846_vm6 = vcmp.le.f32.partialorder %v456_v34, 0.7853982 }
  0xc9   : > { %v620_v50 = vadd.s32 536870912, %v619_v46  ;;  %v780_v51 = vsub.s32 32, %v779_v45  ;;  %v782_v4 = vshll.u32 %v3462_v58, %v779_v45  ;;  %v785_v5 = vshll.u32 %v3463_v60, %v779_v45 }
  0xca   : > { %v2722_v48 = vmin.u32 %v522_v43, %v3758_v33  ;;  %v788_v6 = vshll.u32 %v3464_v63, %v779_v45  ;;  %v791_v7 = vshll.u32 %v3465_v1, %v779_v45  ;;  %v794_v12 = vshll.u32 %v3466_v3, %v779_v45 }
  0xcb   : > { %v3773_v54 = vshrl.u32 %v620_v50, 30  ;;  %v783_v57 = vshrl.u32 %v3463_v60, %v780_v51  ;;  %v786_v62 = vshrl.u32 %v3464_v63, %v780_v51  ;;  %v792_v0 = vshrl.u32 %v3466_v3, %v780_v51 }
  0xcc   : > { %v524_v52 = vclz %v2722_v48  ;;  %v789_v37 = vshrl.u32 %v3465_v1, %v780_v51  ;;  %v795_v38 = vshrl.u32 %v3467_v10, %v780_v51  ;;  %vm797_vm14 = vcmp.lt.s32.totalorder %v3778_v61, 1 }
  0xcd   : > { %v622_v2 = vshll.u32 %v3773_v54, 30  ;;  %v784_v11 = vor.u32 %v783_v57, %v782_v4  ;;  %v787_v15 = vor.u32 %v786_v62, %v785_v5  ;;  %v793_v16 = vor.u32 %v792_v0, %v791_v7 }
  0xce   : > { %v2723_v59 = vadd.s32 4294967294, %v524_v52  ;;  %v790_v19 = vor.u32 %v789_v37, %v788_v6  ;;  %v796_v21 = vor.u32 %v795_v38, %v794_v12  ;;  %vm798_vm15 = vcmp.lt.s32.totalorder %v3778_v61, 2 }
  0xcf   : > { %v3789_v9 = vsub.s32 %v619_v46, %v622_v2  ;;  %v665_v24 = vand.u32 2139095040, %v3769_v35  ;;  %v781_v29 = vshrl.u32 %v3462_v58, %v780_v51  ;;  %vm799_vm0 = vcmp.lt.s32.totalorder %v3778_v61, 3 }
  0xd0   : > { %vm2724_vm13 = vcmp.lt.s32.totalorder %v2723_v59, 0  ;;  %vm800_vm1 = vcmp.lt.s32.totalorder %v3778_v61, 4  ;;  %v805_v36 = vsel %vm797_vm14, %v784_v11, %v787_v15  ;;  %v809_v44 = vsel %vm797_vm14, %v787_v15, %v790_v19 }
  0xd1   : > { %v527_v8 = vsel %vm2724_vm13, 0, %v2723_v59  ;;  %v625_v17 = vsub.s32 0, %v3789_v9  ;;  %v806_v40 = vsel %vm800_vm1, %v793_v16, 920167782  ;;  %v810_v45 = vsel %vm800_vm1, %v796_v21, 1326507024 }
  0xd2   : > { %v528_v13 = vsub.s32 32, %v527_v8  ;;  %v532_v14 = vsub.s32 4294967266, %v527_v8  ;;  %v807_v43 = vsel %vm799_vm0, %v790_v19, %v806_v40  ;;  %v529_v46 = vshll.u32 %v3758_v33, %v527_v8 }
  0xd3   : > { %v2726_v28 = vmin.u32 %v625_v17, %v3789_v9  ;;  %v802_v48 = vsel %vm800_vm1, %v790_v19, 2102212464  ;;  %v811_v49 = vsel %vm799_vm0, %v793_v16, %v810_v45  ;;  %v808_v51 = vsel %vm798_vm15, %v805_v36, %v807_v43 }
  0xd4   : > { %v533_v23 = vadd.s32 127, %v532_v14  ;;  %v530_v30 = vshrl.u32 %v512_v53, %v528_v13  ;;  %v812_v52 = vsel %vm798_vm15, %v809_v44, %v811_v49  ;;  %v813_v53 = vshll.u32 %v773_v18, 8  ;;  %v348_v14 = vpop.permute.xlu1 %347 }
  0xd5   : > { %v627_v41 = vclz %v2726_v28  ;;  %v801_v57 = vsel %vm797_vm14, %v781_v29, %v784_v11  ;;  %v666_v59 = vshrl.u32 %v665_v24, 23  ;;  %v803_v33 = vsel %vm799_vm0, %v787_v15, %v802_v48 }
  0xd6   : > { %v534_v32 = vshll.u32 %v533_v23, 23  ;;  %v531_v55 = vor.u32 %v530_v30, %v529_v46  ;;  %v3817_v62 = vmul.u32.u64.low %v813_v53, %v812_v52  ;;  %v3818_v0 = vmul.u32.u64.high %v813_v53, %v812_v52, %v3817_v62 }
  0xd7   : > { %v2727_v50 = vadd.s32 4294967294, %v627_v41  ;;  %v3820_v37 = vmul.u32.u64.low %v813_v53, %v808_v51  ;;  %v3821_v38 = vmul.u32.u64.high %v813_v53, %v808_v51, %v3820_v37  ;;  %v2729_v7 = vadd.s32 4294967169, %v666_v59 }
  0xd8   : > { %v535_v47 = vor.u32 4788187, %v534_v32  ;;  %v538_v8 = vcvt.s32.f32 %v531_v55  ;;  %v615_v11 = vadd.s32 %v3748_v22, %v3754_v26  ;;  %v804_v12 = vsel %vm798_vm15, %v801_v57, %v803_v33  ;;  %v424_v41 = vpop.permute.xlu1 %423 }
  0xd9   : > { %vm2728_vm2 = vcmp.lt.s32.totalorder %v2727_v50, 0  ;;  %vm822_vm3 = vc.u32 %v3818_v0, %v3820_v37  ;;  %v823_v17 = vadd.s32 1, %v3821_v38  ;;  %v672_v18 = vadd.s32 1, %v2729_v7 }
  0xda   : > { %v536_v2 = vand.u32 2147483647, %v535_v47  ;;  %v630_v4 = vsel %vm2728_vm2, 0, %v2727_v50  ;;  %v542_v19 = vsub.s32 4, %v3744_v20  ;;  %v820_v23 = vmul.u32 %v813_v53, %v804_v12 }
  0xdb   : > { %v631_v5 = vsub.s32 32, %v630_v4  ;;  %v635_v6 = vsub.s32 4294967266, %v630_v4  ;;  %v632_v24 = vshll.u32 %v3789_v9, %v630_v4  ;;  %v824_v22 = vsel %vm822_vm3, %v823_v17, %v3821_v38 }
  0xdc   : > { %v539_v15 = vmul.f32 %v538_v8, %v536_v2  ;;  %v662_v26 = vand.u32 2147483647, %v3769_v35  ;;  %vm673_vm4 = vcmp.gt.s32.totalorder %v672_v18, 0  ;;  %v825_v28 = vadd.s32 %v824_v22, %v820_v23 }
  0xdd   : > { %v636_v13 = vadd.s32 127, %v635_v6  ;;  %v633_v16 = vshrl.u32 %v615_v11, %v631_v5  ;;  %v674_v32 = vsel %vm673_vm4, %v672_v18, 0  ;;  %v3837_v43 = vsel %vm458_vm5, %v542_v19, %v3744_v20 }
  0xde   : > { %v540_v29 = vxor.u32 2147483648, %v539_v15  ;;  %v826_v36 = vadd.s32 536870912, %v825_v28  ;;  %v676_v40 = vand.u32 31, %v674_v32  ;;  %v669_v9 = vand.u32 8388607, %v662_v26 }
  0xdf   : > { %v637_v21 = vshll.u32 %v636_v13, 23  ;;  %v634_v30 = vor.u32 %v633_v16, %v632_v24  ;;  %v381_v45 = vmul.f32 %v3671_v27, %v348_v14  ;;  %v545_v20 = vsel %vm3846_vm6, 0, %v3837_v43 }
  0xe0   : > { %v3842_v46 = vshrl.u32 %v826_v36, 30  ;;  %v677_v47 = vsub.s32 32, %v676_v40  ;;  %v541_v49 = vsel %vm458_vm5, %v540_v29, %v539_v15  ;;  %vm561_vm7 = vcmp.lt.s32.totalorder %v3681_v39, 0 }
  0xe1   : > { %v638_v61 = vor.u32 4788187, %v637_v21  ;;  %v641_v50 = vcvt.s32.f32 %v634_v30  ;;  %v3850_v51 = vadd.f32 %v424_v41, %v381_v45  ;;  %v670_v55 = vor.u32 8388608, %v669_v9 }
  0xe2   : > { %v828_v52 = vshll.u32 %v3842_v46, 30  ;;  %v680_v57 = vshrl.u32 %v3463_v60, %v677_v47  ;;  %v683_v34 = vshrl.u32 %v3464_v63, %v677_v47  ;;  %v544_v59 = vsel %vm3846_vm6, %v3674_v31, %v541_v49 }
  0xe3   : > { %v639_v44 = vand.u32 2147483647, %v638_v61  ;;  %v686_v62 = vshrl.u32 %v3465_v1, %v677_v47  ;;  %v689_v2 = vshrl.u32 %v3466_v3, %v677_v47  ;;  %v679_v4 = vshll.u32 %v3462_v58, %v676_v40 }
  0xe4   : > { %v3862_v33 = vsub.s32 %v825_v28, %v828_v52  ;;  %v682_v38 = vshll.u32 %v3463_v60, %v676_v40  ;;  %v692_v5 = vshrl.u32 %v3467_v10, %v677_v47  ;;  %v974_v6 = vand.u32 2139095040, %v3850_v51 }
  0xe5   : > { %v642_v53 = vmul.f32 %v641_v50, %v639_v44  ;;  %v675_v8 = vshrl.u32 %v674_v32, 5  ;;  %v685_v11 = vshll.u32 %v3464_v63, %v676_v40  ;;  %v688_v12 = vshll.u32 %v3465_v1, %v676_v40 }
  0xe6   : > { %v831_v7 = vsub.s32 0, %v3862_v33  ;;  %v681_v14 = vor.u32 %v680_v57, %v679_v4  ;;  %v684_v15 = vor.u32 %v683_v34, %v682_v38  ;;  %v691_v16 = vshll.u32 %v3466_v3, %v676_v40 }
  0xe7   : > { %v643_v13 = vxor.u32 2147483648, %v642_v53  ;;  %3320 = vcosq.f32 %v544_v59  ;;  %vm3876_vm8 = vcmp.le.f32.partialorder %v559_v42, 0.7853982  ;;  %v687_v19 = vor.u32 %v686_v62, %v685_v11 }
  0xe8   : > { %v2734_v18 = vmin.u32 %v831_v7, %v3862_v33  ;;  %v690_v21 = vor.u32 %v689_v2, %v688_v12  ;;  %3322 = vsinq.f32 %v544_v59  ;;  %v645_v23 = vsub.s32 4, %v3773_v54 }
  0xe9   : > { %v693_v24 = vor.u32 %v692_v5, %v691_v16  ;;  %v710_v22 = vshll.u32 %v670_v55, 8  ;;  %v678_v28 = vshrl.u32 %v3462_v58, %v677_v47  ;;  %vm694_vm9 = vcmp.lt.s32.totalorder %v675_v8, 1 }
  0xea   : > { %v833_v61 = vclz %v2734_v18  ;;  %v975_v29 = vshrl.u32 %v974_v6, 23  ;;  %v644_v42 = vsel %vm561_vm7, %v643_v13, %v642_v53  ;;  %vm695_vm10 = vcmp.lt.s32.totalorder %v675_v8, 2  ;;  %v343_v6 = vpop.permute.xlu0 %342 }
  0xeb   : > { %vm697_vm11 = vcmp.lt.s32.totalorder %v675_v8, 4  ;;  %v702_v30 = vsel %vm694_vm9, %v681_v14, %v684_v15  ;;  %vm696_vm12 = vcmp.lt.s32.totalorder %v675_v8, 3  ;;  %v698_v41 = vsel %vm694_vm9, %v678_v28, %v681_v14 }
  0xec   : > { %v2735_v32 = vadd.s32 4294967294, %v833_v61  ;;  %v699_v36 = vsel %vm697_vm11, %v687_v19, 2102212464  ;;  %v703_v40 = vsel %vm697_vm11, %v690_v21, 920167782  ;;  %v706_v9 = vsel %vm694_vm9, %v684_v15, %v687_v19 }
  0xed   : > { %v704_v44 = vsel %vm696_vm12, %v687_v19, %v703_v40  ;;  %v707_v45 = vsel %vm697_vm11, %v693_v24, 1326507024  ;;  %v700_v49 = vsel %vm696_vm12, %v684_v15, %v699_v36  ;;  %v821_v34 = vadd.s32 %v3820_v37, %v3818_v0 }
  0xee   : > { %vm2736_vm13 = vcmp.lt.s32.totalorder %v2735_v32, 0  ;;  %v705_v47 = vsel %vm695_vm10, %v702_v30, %v704_v44  ;;  %v708_v50 = vsel %vm696_vm12, %v690_v21, %v707_v45  ;;  %v971_v2 = vand.u32 2147483647, %v3850_v51  ;;  %v419_v28 = vpop.permute.xlu0 %418 }
  0xef   : > { %v836_v52 = vsel %vm2736_vm13, 0, %v2735_v32  ;;  %v709_v55 = vsel %vm695_vm10, %v706_v9, %v708_v50  ;;  %v3887_v53 = vmul.u32.u64.low %v710_v22, %v705_v47  ;;  %v3888_v57 = vmul.u32.u64.high %v710_v22, %v705_v47, %v3887_v53 }
  0xf0   : > { %v837_v59 = vsub.s32 32, %v836_v52  ;;  %v841_v62 = vsub.s32 4294967266, %v836_v52  ;;  %v647_v4 = vsel %vm3876_vm8, %v3681_v39, %v644_v42  ;;  %v2741_v7 = vadd.s32 4294967169, %v975_v29 }
  0xf1   : > { %v3897_v38 = vmul.u32.u64.low %v710_v22, %v709_v55  ;;  %v3898_v5 = vmul.u32.u64.high %v710_v22, %v709_v55, %v3897_v38  ;;  %v3321_v11 = vpop.eup %3320  ;;  %v549_v12 = vand.u32 3, %v545_v20  ;;  %v701_v13 = vsel %vm695_vm10, %v698_v41, %v700_v49 }
  0xf2   : > { %v839_v0 = vshrl.u32 %v821_v34, %v837_v59  ;;  %v842_v37 = vadd.s32 127, %v841_v62  ;;  %v3323_v14 = vpop.eup %3322  ;;  %v646_v15 = vsel %vm561_vm7, %v645_v23, %v3773_v54  ;;  %v720_v16 = vadd.s32 1, %v3888_v57 }
  0xf3   : > { %v981_v18 = vadd.s32 1, %v2741_v7  ;;  %3324 = vcosq.f32 %v647_v4  ;;  %v838_v19 = vshll.u32 %v3862_v33, %v836_v52  ;;  %v717_v48 = vmul.u32 %v710_v22, %v701_v13 }
  0xf4   : > { %v843_v21 = vshll.u32 %v842_v37, 23  ;;  %vm719_vm14 = vc.u32 %v3898_v5, %v3887_v53  ;;  %v978_v43 = vand.u32 8388607, %v971_v2  ;;  %vm550_vm0 = vcmp.lt.s32.totalorder %v549_v12, 2 }
  0xf5   : > { %vm982_vm15 = vcmp.gt.s32.totalorder %v981_v18, 0  ;;  %v648_v20 = vsel %vm3876_vm8, 0, %v646_v15  ;;  %vm767_vm1 = vcmp.lt.s32.totalorder %v3690_v56, 0  ;;  %v840_v54 = vor.u32 %v839_v0, %v838_v19 }
  0xf6   : > { %v844_v8 = vor.u32 4788187, %v843_v21  ;;  %v721_v23 = vsel %vm719_vm14, %v720_v16, %v3888_v57  ;;  %v552_v33 = vxor.u32 2147483648, %v3323_v14  ;;  %v555_v24 = vxor.u32 2147483648, %v3321_v11 }
  0xf7   : > { %v722_v22 = vadd.s32 %v721_v23, %v717_v48  ;;  %v983_v61 = vsel %vm982_vm15, %v981_v18, 0  ;;  %vm551_vm2 = vcmp.eq.s32.totalorder %v549_v12, 0  ;;  %v380_v42 = vmul.f32 %v3671_v27, %v343_v6 }
  0xf8   : > { %v845_v29 = vand.u32 2147483647, %v844_v8  ;;  %v985_v30 = vand.u32 31, %v983_v61  ;;  %vm554_vm3 = vcmp.eq.s32.totalorder %v549_v12, 2  ;;  %v3919_v32 = vand.u32 3, %v648_v20 }
  0xf9   : > { %v723_v17 = vadd.s32 536870912, %v722_v22  ;;  %v979_v36 = vor.u32 8388608, %v978_v43  ;;  %v847_v40 = vcvt.s32.f32 %v840_v54  ;;  %v851_v41 = vsub.s32 4, %v3842_v46 }
  0xfa   : > { %v986_v44 = vsub.s32 32, %v985_v30  ;;  %v3922_v9 = vadd.f32 %v419_v28, %v380_v42  ;;  %v553_v45 = vsel %vm551_vm2, %v3321_v11, %v552_v33  ;;  %v556_v49 = vsel %vm554_vm3, %v555_v24, %v3323_v14 }
  0xfb   : > { %3326 = vsinq.f32 %v647_v4  ;;  %v3924_v47 = vshrl.u32 %v723_v17, 30  ;;  %v3926_v50 = vmul.f32 %v847_v40, %v845_v29  ;;  %v984_v52 = vshrl.u32 %v983_v61, 5 }
  0xfc   : > { %v989_v55 = vshrl.u32 %v3463_v60, %v986_v44  ;;  %v992_v57 = vshrl.u32 %v3464_v63, %v986_v44  ;;  %v988_v59 = vshll.u32 %v3462_v58, %v985_v30  ;;  %v995_v62 = vshrl.u32 %v3465_v1, %v986_v44 }
  0xfd   : > { %v725_v34 = vshll.u32 %v3924_v47, 30  ;;  %v998_v38 = vshrl.u32 %v3466_v3, %v986_v44  ;;  %v3934_v6 = vpop.eup %3324  ;;  %v991_v4 = vshll.u32 %v3463_v60, %v985_v30  ;;  %v994_v7 = vshll.u32 %v3464_v63, %v985_v30 }
  0xfe   : > { %v997_v11 = vshll.u32 %v3465_v1, %v985_v30  ;;  %v1001_v0 = vshrl.u32 %v3467_v10, %v986_v44  ;;  %v557_v37 = vsel %vm550_vm0, %v553_v45, %v556_v49  ;;  %v3944_v13 = vsel %vm767_vm1, %v851_v41, %v3842_v46 }
  0xff   : > { %v3946_v14 = vsub.s32 %v722_v22, %v725_v34  ;;  %v1000_v15 = vshll.u32 %v3466_v3, %v985_v30  ;;  %vm548_vm4 = vweird.f32 %v3674_v31  ;;  %vm3952_vm5 = vcmp.le.f32.partialorder %v765_v25, 0.7853982 }
 0x100   : > { %v990_v18 = vor.u32 %v989_v55, %v988_v59  ;;  %v993_v12 = vor.u32 %v992_v57, %v991_v4  ;;  %v996_v19 = vor.u32 %v995_v62, %v994_v7  ;;  %v999_v21 = vor.u32 %v998_v38, %v997_v11 }
 0x101   : > { %vm657_vm6 = vcmp.eq.s32.totalorder %v3919_v32, 2  ;;  %v658_v46 = vxor.u32 2147483648, %v3934_v6  ;;  %v728_v48 = vsub.s32 0, %v3946_v14  ;;  %v1002_v43 = vor.u32 %v1001_v0, %v1000_v15 }
 0x102   : > { %v1019_v20 = vshll.u32 %v979_v36, 8  ;;  %v849_v54 = vxor.u32 2147483648, %v3926_v50  ;;  %v987_v8 = vshrl.u32 %v3462_v58, %v986_v44  ;;  %vm1003_vm7 = vcmp.lt.s32.totalorder %v984_v52, 1 }
 0x103   : > { %v871_v25 = vand.u32 2139095040, %v3922_v9  ;;  %vm654_vm8 = vcmp.eq.s32.totalorder %v3919_v32, 0  ;;  %v2730_v23 = vmin.u32 %v728_v48, %v3946_v14  ;;  %vm1004_vm9 = vcmp.lt.s32.totalorder %v984_v52, 2 }
 0x104   : > { %vm1005_vm10 = vcmp.lt.s32.totalorder %v984_v52, 3  ;;  %vm1006_vm11 = vcmp.lt.s32.totalorder %v984_v52, 4  ;;  %v1011_v24 = vsel %vm1003_vm7, %v990_v18, %v993_v12  ;;  %v1015_v61 = vsel %vm1003_vm7, %v993_v12, %v996_v19 }
 0x105   : > { %v1008_v33 = vsel %vm1006_vm11, %v996_v19, 2102212464  ;;  %v1012_v22 = vsel %vm1006_vm11, %v999_v21, 920167782  ;;  %v3327_v28 = vpop.eup %3326  ;;  %v730_v29 = vclz %v2730_v23  ;;  %v1007_v42 = vsel %vm1003_vm7, %v987_v8, %v990_v18 }
 0x106   : > { %v1013_v30 = vsel %vm1005_vm10, %v996_v19, %v1012_v22  ;;  %v1016_v17 = vsel %vm1006_vm11, %v1002_v43, 1326507024  ;;  %v1009_v36 = vsel %vm1005_vm10, %v993_v12, %v1008_v33  ;;  %v872_v44 = vshrl.u32 %v871_v25, 23  ;;  %v358_v33 = vpop.permute.xlu1 %357 }
 0x107   : > { %v1014_v40 = vsel %vm1004_vm9, %v1011_v24, %v1013_v30  ;;  %v1017_v41 = vsel %vm1005_vm10, %v999_v21, %v1016_v17  ;;  %v2731_v45 = vadd.s32 4294967294, %v730_v29  ;;  %vm653_vm12 = vcmp.lt.s32.totalorder %v3919_v32, 2 }
 0x108   : > { %v1018_v49 = vsel %vm1004_vm9, %v1015_v61, %v1017_v41  ;;  %v3966_v55 = vmul.u32.u64.low %v1019_v20, %v1014_v40  ;;  %v3967_v57 = vmul.u32.u64.high %v1019_v20, %v1014_v40, %v3966_v55  ;;  %v655_v34 = vxor.u32 2147483648, %v3327_v28 }
 0x109   : > { %v3971_v59 = vmul.u32.u64.low %v1019_v20, %v1018_v49  ;;  %v3972_v62 = vmul.u32.u64.high %v1019_v20, %v1018_v49, %v3971_v59  ;;  %v2737_v38 = vadd.s32 4294967169, %v872_v44  ;;  %v3976_v4 = vsel %vm548_vm4, nan, %v557_v37 }
 0x10a   : > { %v854_v7 = vsel %vm3952_vm5, 0, %v3944_v13  ;;  %vm664_vm13 = vcmp.lt.s32.totalorder %v3769_v35, 0  ;;  %vm2732_vm14 = vcmp.lt.s32.totalorder %v2731_v45, 0  ;;  %v1010_v11 = vsel %vm1004_vm9, %v1007_v42, %v1009_v36 }
 0x10b   : > { %v659_v0 = vsel %vm657_vm6, %v658_v46, %v3327_v28  ;;  %v733_v15 = vsel %vm2732_vm14, 0, %v2731_v45  ;;  %v868_v18 = vand.u32 2147483647, %v3922_v9  ;;  %v878_v12 = vadd.s32 1, %v2737_v38 }
 0x10c   : > { %v850_v31 = vsel %vm767_vm1, %v849_v54, %v3926_v50  ;;  %v718_v37 = vadd.s32 %v3887_v53, %v3898_v5  ;;  %v734_v13 = vsub.s32 32, %v733_v15  ;;  %v738_v19 = vsub.s32 4294967266, %v733_v15 }
 0x10d   : > { %v656_v52 = vsel %vm654_vm8, %v3934_v6, %v655_v34  ;;  %v1026_v21 = vmul.u32 %v1019_v20, %v1010_v11  ;;  %vm1028_vm15 = vc.u32 %v3972_v62, %v3966_v55  ;;  %v1029_v46 = vadd.s32 1, %v3967_v57 }
 0x10e   : > { %v735_v48 = vshll.u32 %v3946_v14, %v733_v15  ;;  %v736_v43 = vshrl.u32 %v718_v37, %v734_v13  ;;  %v739_v8 = vadd.s32 127, %v738_v19  ;;  %vm879_vm0 = vcmp.gt.s32.totalorder %v878_v12, 0  ;;  %v434_v15 = vpop.permute.xlu1 %433 }
 0x10f   : > { %v853_v53 = vsel %vm3952_vm5, %v3690_v56, %v850_v31  ;;  %v748_v5 = vsub.s32 4, %v3924_v47  ;;  %v1030_v50 = vsel %vm1028_vm15, %v1029_v46, %v3967_v57  ;;  %v880_v6 = vsel %vm879_vm0, %v878_v12, 0 }
 0x110   : > { %v737_v20 = vor.u32 %v736_v43, %v735_v48  ;;  %v740_v54 = vshll.u32 %v739_v8, 23  ;;  %v1031_v25 = vadd.s32 %v1030_v50, %v1026_v21  ;;  %v875_v23 = vand.u32 8388607, %v868_v18 }
 0x111   : > { %v1496_v14 = vand.u32 4294901760, %v3976_v4  ;;  %v4006_v24 = vand.u32 3, %v854_v7  ;;  %vm4010_vm1 = vcmp.le.f32.partialorder %v662_v26, 0.7853982  ;;  %v882_v22 = vand.u32 31, %v880_v6 }
 0x112   : > { %v4016_v61 = vsel %vm653_vm12, %v656_v52, %v659_v0  ;;  %3328 = vcosq.f32 %v853_v53  ;;  %v741_v28 = vor.u32 4788187, %v740_v54  ;;  %v1032_v29 = vadd.s32 536870912, %v1031_v25 }
 0x113   : > { %3330 = vsinq.f32 %v853_v53  ;;  %v4021_v42 = vsel %vm664_vm13, %v748_v5, %v3924_v47  ;;  %v883_v30 = vsub.s32 32, %v882_v22  ;;  %v383_v26 = vmul.f32 %v3671_v27, %v358_v33 }
 0x114   : > { %v742_v17 = vand.u32 2147483647, %v741_v28  ;;  %v744_v36 = vcvt.s32.f32 %v737_v20  ;;  %v4024_v40 = vshrl.u32 %v1032_v29, 30  ;;  %v876_v41 = vor.u32 8388608, %v875_v23 }
 0x115   : > { %v885_v32 = vshll.u32 %v3462_v58, %v882_v22  ;;  %v886_v44 = vshrl.u32 %v3463_v60, %v883_v30  ;;  %v889_v45 = vshrl.u32 %v3464_v63, %v883_v30  ;;  %v892_v49 = vshrl.u32 %v3465_v1, %v883_v30 }
 0x116   : > { %v745_v57 = vmul.f32 %v744_v36, %v742_v17  ;;  %v1034_v47 = vshll.u32 %v4024_v40, 30  ;;  %v888_v34 = vshll.u32 %v3463_v60, %v882_v22  ;;  %v895_v59 = vshrl.u32 %v3466_v3, %v883_v30 }
 0x117   : > { %v881_v38 = vshrl.u32 %v880_v6, 5  ;;  %v891_v7 = vshll.u32 %v3464_v63, %v882_v22  ;;  %v894_v11 = vshll.u32 %v3465_v1, %v882_v22  ;;  %v898_v0 = vshrl.u32 %v3467_v10, %v883_v30 }
 0x118   : > { %vm651_vm2 = vweird.f32 %v3681_v39  ;;  %v746_v12 = vxor.u32 2147483648, %v745_v57  ;;  %v4037_v31 = vsub.s32 %v1031_v25, %v1034_v47  ;;  %v887_v37 = vor.u32 %v886_v44, %v885_v32 }
 0x119   : > { %v890_v13 = vor.u32 %v889_v45, %v888_v34  ;;  %v751_v19 = vsel %vm4010_vm1, 0, %v4021_v42  ;;  %v893_v52 = vor.u32 %v892_v49, %v891_v7  ;;  %v896_v21 = vor.u32 %v895_v59, %v894_v11  ;;  %v353_v42 = vpop.permute.xlu0 %352 }
 0x11a   : > { %v897_v46 = vshll.u32 %v3466_v3, %v882_v22  ;;  %v747_v48 = vsel %vm664_vm13, %v746_v12, %v745_v57  ;;  %v1037_v43 = vsub.s32 0, %v4037_v31  ;;  %v4046_v8 = vshll.u32 %v876_v41, 8 }
 0x11b   : > { %v4048_v53 = vadd.f32 %v434_v15, %v383_v26  ;;  %v750_v5 = vsel %vm4010_vm1, %v3769_v35, %v747_v48  ;;  %v884_v50 = vshrl.u32 %v3462_v58, %v883_v30  ;;  %vm900_vm3 = vcmp.lt.s32.totalorder %v881_v38, 1 }
 0x11c   : > { %v899_v6 = vor.u32 %v898_v0, %v897_v46  ;;  %v3329_v20 = vpop.eup %3328  ;;  %vm863_vm4 = vcmp.eq.s32.totalorder %v4006_v24, 2  ;;  %3332 = vcosq.f32 %v750_v5  ;;  %v2742_v54 = vmin.u32 %v1037_v43, %v4037_v31 }
 0x11d   : > { %vm903_vm5 = vcmp.lt.s32.totalorder %v881_v38, 4  ;;  %v908_v25 = vsel %vm900_vm3, %v887_v37, %v890_v13  ;;  %v3331_v23 = vpop.eup %3330  ;;  %3334 = vsinq.f32 %v750_v5  ;;  %vm902_vm6 = vcmp.lt.s32.totalorder %v881_v38, 3 }
 0x11e   : > { %v905_v33 = vsel %vm903_vm5, %v893_v52, 2102212464  ;;  %v909_v16 = vsel %vm903_vm5, %v896_v21, 920167782  ;;  %v1039_v22 = vclz %v2742_v54  ;;  %vm901_vm7 = vcmp.lt.s32.totalorder %v881_v38, 2 }
 0x11f   : > { %v910_v28 = vsel %vm902_vm6, %v893_v52, %v909_v16  ;;  %v912_v29 = vsel %vm900_vm3, %v890_v13, %v893_v52  ;;  %vm860_vm8 = vcmp.eq.s32.totalorder %v4006_v24, 0  ;;  %v904_v30 = vsel %vm900_vm3, %v884_v50, %v887_v37 }
 0x120   : > { %v906_v26 = vsel %vm902_vm6, %v890_v13, %v905_v33  ;;  %v911_v17 = vsel %vm901_vm7, %v908_v25, %v910_v28  ;;  %v913_v36 = vsel %vm903_vm5, %v899_v6, 1326507024  ;;  %v2743_v41 = vadd.s32 4294967294, %v1039_v22 }
 0x121   : > { %v914_v32 = vsel %vm902_vm6, %v896_v21, %v913_v36  ;;  %v4065_v44 = vmul.u32.u64.low %v4046_v8, %v911_v17  ;;  %v4066_v45 = vmul.u32.u64.high %v4046_v8, %v911_v17, %v4065_v44  ;;  %v4072_v49 = vsel %vm651_vm2, nan, %v4016_v61  ;;  %v429_v21 = vpop.permute.xlu0 %428 }
 0x122   : > { %v864_v57 = vxor.u32 2147483648, %v3329_v20  ;;  %v915_v47 = vsel %vm901_vm7, %v912_v29, %v914_v32  ;;  %v1180_v34 = vand.u32 2139095040, %v4048_v53  ;;  %vm859_vm9 = vcmp.lt.s32.totalorder %v4006_v24, 2 }
 0x123   : > { %vm2744_vm10 = vcmp.lt.s32.totalorder %v2743_v41, 0  ;;  %v907_v59 = vsel %vm901_vm7, %v904_v30, %v906_v26  ;;  %v4079_v7 = vmul.u32.u64.low %v4046_v8, %v915_v47  ;;  %v4080_v11 = vmul.u32.u64.high %v4046_v8, %v915_v47, %v4079_v7 }
 0x124   : > { %v861_v0 = vxor.u32 2147483648, %v3331_v23  ;;  %v755_v15 = vand.u32 3, %v751_v19  ;;  %v1042_v12 = vsel %vm2744_vm10, 0, %v2743_v41  ;;  %v1181_v39 = vshrl.u32 %v1180_v34, 23 }
 0x125   : > { %v1027_v61 = vadd.s32 %v3966_v55, %v3972_v62  ;;  %v1043_v37 = vsub.s32 32, %v1042_v12  ;;  %v1047_v13 = vsub.s32 4294967266, %v1042_v12  ;;  %v926_v52 = vadd.s32 1, %v4066_v45 }
 0x126   : > { %vm857_vm11 = vweird.f32 %v3690_v56  ;;  %v865_v38 = vsel %vm863_vm4, %v864_v57, %v3331_v23  ;;  %vm973_vm12 = vcmp.lt.s32.totalorder %v3850_v51, 0  ;;  %v923_v46 = vmul.u32 %v4046_v8, %v907_v59  ;;  %v3333_v43 = vpop.eup %3332 }
 0x127   : > { %v382_v19 = vmul.f32 %v3671_v27, %v353_v42  ;;  %v2749_v48 = vadd.s32 4294967169, %v1181_v39  ;;  %v1044_v55 = vshll.u32 %v4037_v31, %v1042_v12  ;;  %v1045_v62 = vshrl.u32 %v1027_v61, %v1043_v37  ;;  %v3335_v50 = vpop.eup %3334 }
 0x128   : > { %v1048_v5 = vadd.s32 127, %v1047_v13  ;;  %vm925_vm13 = vc.u32 %v4080_v11, %v4065_v44  ;;  %v1177_v54 = vand.u32 2147483647, %v4048_v53  ;;  %v862_v8 = vsel %vm860_vm8, %v3329_v20, %v861_v0 }
 0x129   : > { %v927_v6 = vsel %vm925_vm13, %v926_v52, %v4066_v45  ;;  %v1187_v25 = vadd.s32 1, %v2749_v48  ;;  %v4096_v23 = vadd.f32 %v429_v21, %v382_v19  ;;  %v1046_v33 = vor.u32 %v1045_v62, %v1044_v55 }
 0x12a   : > { %v1049_v16 = vshll.u32 %v1048_v5, 23  ;;  %v928_v22 = vadd.s32 %v927_v6, %v923_v46  ;;  %v1499_v31 = vand.u32 4294901760, %v4072_v49  ;;  %v758_v28 = vxor.u32 2147483648, %v3335_v50 }
 0x12b   : > { %v761_v29 = vxor.u32 2147483648, %v3333_v43  ;;  %vm1188_vm14 = vcmp.gt.s32.totalorder %v1187_v25, 0  ;;  %vm754_vm15 = vweird.f32 %v3769_v35  ;;  %vm757_vm0 = vcmp.eq.s32.totalorder %v755_v15, 0 }
 0x12c   : > { %v1050_v42 = vor.u32 4788187, %v1049_v16  ;;  %v1057_v30 = vsub.s32 4, %v4024_v40  ;;  %v929_v26 = vadd.s32 536870912, %v928_v22  ;;  %v866_v17 = vsel %vm859_vm9, %v862_v8, %v865_v38 }
 0x12d   : > { %vm4107_vm1 = vcmp.le.f32.partialorder %v971_v2, 0.7853982  ;;  %v1184_v36 = vand.u32 8388607, %v1177_v54  ;;  %v1189_v41 = vsel %vm1188_vm14, %v1187_v25, 0  ;;  %v1077_v32 = vand.u32 2139095040, %v4096_v23 }
 0x12e   : > { %vm760_vm2 = vcmp.eq.s32.totalorder %v755_v15, 2  ;;  %v1051_v45 = vand.u32 2147483647, %v1050_v42  ;;  %v1053_v57 = vcvt.s32.f32 %v1046_v33  ;;  %v4114_v47 = vshrl.u32 %v929_v26, 30 }
 0x12f   : > { %vm756_vm3 = vcmp.lt.s32.totalorder %v755_v15, 2  ;;  %v759_v24 = vsel %vm757_vm0, %v3333_v43, %v758_v28  ;;  %v762_v34 = vsel %vm760_vm2, %v761_v29, %v3335_v50  ;;  %v1191_v59 = vand.u32 31, %v1189_v41 }
 0x130   : > { %v4118_v2 = vsel %vm857_vm11, nan, %v866_v17  ;;  %v1054_v7 = vmul.f32 %v1053_v57, %v1051_v45  ;;  %v4123_v0 = vsel %vm973_vm12, %v1057_v30, %v4024_v40  ;;  %v931_v12 = vshll.u32 %v4114_v47, 30 }
 0x131   : > { %v1185_v39 = vor.u32 8388608, %v1184_v36  ;;  %v1192_v61 = vsub.s32 32, %v1191_v59  ;;  %v1074_v37 = vand.u32 2147483647, %v4096_v23  ;;  %v1078_v15 = vshrl.u32 %v1077_v32, 23 }
 0x132   : > { %v763_v13 = vsel %vm756_vm3, %v759_v24, %v762_v34  ;;  %v1055_v52 = vxor.u32 2147483648, %v1054_v7  ;;  %v924_v56 = vadd.s32 %v4065_v44, %v4080_v11  ;;  %v4129_v21 = vsub.s32 %v928_v22, %v931_v12 }
 0x133   : > { %v1190_v38 = vshrl.u32 %v1189_v41, 5  ;;  %v1194_v46 = vshll.u32 %v3462_v58, %v1191_v59  ;;  %v1195_v40 = vshrl.u32 %v3463_v60, %v1192_v61  ;;  %v1198_v19 = vshrl.u32 %v3464_v63, %v1192_v61 }
 0x134   : > { %v1056_v48 = vsel %vm973_vm12, %v1055_v52, %v1054_v7  ;;  %v934_v43 = vsub.s32 0, %v4129_v21  ;;  %v1197_v55 = vshll.u32 %v3463_v60, %v1191_v59  ;;  %v1201_v62 = vshrl.u32 %v3465_v1, %v1192_v61 }
 0x135   : > { %v4141_v44 = vsel %vm754_vm15, nan, %v763_v13  ;;  %v1200_v11 = vshll.u32 %v3464_v63, %v1191_v59  ;;  %v4144_v5 = vshll.u32 %v1185_v39, 8  ;;  %v2745_v50 = vadd.s32 4294967169, %v1078_v15 }
 0x136   : > { %v1059_v6 = vsel %vm4107_vm1, %v3850_v51, %v1056_v48  ;;  %v2738_v25 = vmin.u32 %v934_v43, %v4129_v21  ;;  %v1196_v8 = vor.u32 %v1195_v40, %v1194_v46  ;;  %v1199_v33 = vor.u32 %v1198_v19, %v1197_v55 }
 0x137   : > { %v954_v16 = vsub.s32 4, %v4114_v47  ;;  %v1202_v22 = vor.u32 %v1201_v62, %v1200_v11  ;;  %v1203_v35 = vshll.u32 %v3465_v1, %v1191_v59  ;;  %v1204_v28 = vshrl.u32 %v3466_v3, %v1192_v61 }
 0x138   : > { %vm870_vm4 = vcmp.lt.s32.totalorder %v3922_v9, 0  ;;  %v936_v29 = vclz %v2738_v25  ;;  %v1206_v42 = vshll.u32 %v3466_v3, %v1191_v59  ;;  %v1207_v30 = vshrl.u32 %v3467_v10, %v1192_v61 }
 0x139   : > { %vm1209_vm5 = vcmp.lt.s32.totalorder %v1190_v38, 1  ;;  %3336 = vcosq.f32 %v1059_v6  ;;  %v1193_v26 = vshrl.u32 %v3462_v58, %v1192_v61  ;;  %v1205_v17 = vor.u32 %v1204_v28, %v1203_v35 }
 0x13a   : > { %vm1210_vm6 = vcmp.lt.s32.totalorder %v1190_v38, 2  ;;  %v2739_v36 = vadd.s32 4294967294, %v936_v29  ;;  %v1208_v41 = vor.u32 %v1207_v30, %v1206_v42  ;;  %vm1212_vm7 = vcmp.lt.s32.totalorder %v1190_v38, 4 }
 0x13b   : > { %v1217_v32 = vsel %vm1209_vm5, %v1196_v8, %v1199_v33  ;;  %vm4160_vm8 = vcmp.le.f32.partialorder %v868_v18, 0.7853982  ;;  %vm1211_vm9 = vcmp.lt.s32.totalorder %v1190_v38, 3  ;;  %v1214_v57 = vsel %vm1212_vm7, %v1202_v22, 2102212464 }
 0x13c   : > { %v1218_v24 = vsel %vm1212_vm7, %v1205_v17, 920167782  ;;  %v1221_v34 = vsel %vm1209_vm5, %v1199_v33, %v1202_v22  ;;  %vm2740_vm10 = vcmp.lt.s32.totalorder %v2739_v36, 0  ;;  %v1222_v7 = vsel %vm1212_vm7, %v1208_v41, 1326507024 }
 0x13d   : > { %v1219_v59 = vsel %vm1211_vm9, %v1202_v22, %v1218_v24  ;;  %v1084_v12 = vadd.s32 1, %v2745_v50  ;;  %v939_v39 = vsel %vm2740_vm10, 0, %v2739_v36  ;;  %v1213_v61 = vsel %vm1209_vm5, %v1193_v26, %v1196_v8 }
 0x13e   : > { %v1220_v15 = vsel %vm1210_vm6, %v1217_v32, %v1219_v59  ;;  %v1223_v13 = vsel %vm1211_vm9, %v1205_v17, %v1222_v7  ;;  %v940_v52 = vsub.s32 32, %v939_v39  ;;  %v944_v18 = vsub.s32 4294967266, %v939_v39 }
 0x13f   : > { %v1215_v46 = vsel %vm1211_vm9, %v1199_v33, %v1214_v57  ;;  %v1224_v40 = vsel %vm1210_vm6, %v1221_v34, %v1223_v13  ;;  %v4173_v43 = vmul.u32.u64.low %v4144_v5, %v1220_v15  ;;  %v4174_v55 = vmul.u32.u64.high %v4144_v5, %v1220_v15, %v4173_v43 }
 0x140   : > { %v4169_v19 = vmul.u32.u64.low %v4144_v5, %v1224_v40  ;;  %v4170_v48 = vmul.u32.u64.high %v4144_v5, %v1224_v40, %v4169_v19  ;;  %v941_v62 = vshll.u32 %v4129_v21, %v939_v39  ;;  %v942_v11 = vshrl.u32 %v924_v56, %v940_v52  ;;  %v368_v21 = vpop.permute.xlu1 %367  ;;  %v363_v56 = vpop.permute.xlu0 %362 }
 0x141   : > { %v945_v50 = vadd.s32 127, %v944_v18  ;;  %vm1085_vm11 = vcmp.gt.s32.totalorder %v1084_v12, 0  ;;  %3338 = vsinq.f32 %v1059_v6  ;;  %v955_v25 = vsel %vm870_vm4, %v954_v16, %v4114_v47 }
 0x142   : > { %v1216_v8 = vsel %vm1210_vm6, %v1213_v61, %v1215_v46  ;;  %v1086_v33 = vsel %vm1085_vm11, %v1084_v12, 0  ;;  %v1505_v22 = vand.u32 4294901760, %v4118_v2  ;;  %v1060_v35 = vsel %vm4107_vm1, 0, %v4123_v0 }
 0x143   : > { %v943_v28 = vor.u32 %v942_v11, %v941_v62  ;;  %v946_v29 = vshll.u32 %v945_v50, 23  ;;  %v4186_v42 = vpop.eup %3336  ;;  %v1502_v6 = vand.u32 4294901760, %v4141_v44  ;;  %vm1234_vm12 = vc.u32 %v4170_v48, %v4173_v43 }
 0x144   : > { %v1235_v47 = vadd.s32 1, %v4174_v55  ;;  %v1081_v38 = vand.u32 8388607, %v1074_v37  ;;  %v957_v20 = vsel %vm4160_vm8, 0, %v955_v25  ;;  %v1232_v0 = vmul.u32 %v4144_v5, %v1216_v8 }
 0x145   : > { %v947_v16 = vor.u32 4788187, %v946_v29  ;;  %v1088_v30 = vand.u32 31, %v1086_v33  ;;  %v4197_v26 = vand.u32 3, %v1060_v35  ;;  %v385_v36 = vmul.f32 %v3671_v27, %v368_v21  ;;  %v444_v35 = vpop.permute.xlu1 %443 }
 0x146   : > { %v1236_v17 = vsel %vm1234_vm12, %v1235_v47, %v4174_v55  ;;  %v4202_v41 = vmul.f32 %v3671_v27, %v363_v56  ;;  %v950_v57 = vcvt.s32.f32 %v943_v28  ;;  %v4208_v59 = vpack.c.bf16 %v1505_v22, %v1502_v6 }
 0x147   : > { %v948_v32 = vand.u32 2147483647, %v947_v16  ;;  %v1237_v24 = vadd.s32 %v1236_v17, %v1232_v0  ;;  %v1089_v34 = vsub.s32 32, %v1088_v30  ;;  %v4210_v5 = vand.u32 3, %v957_v20 }
 0x148   : > { %v1082_v7 = vor.u32 8388608, %v1081_v38  ;;  %v4212_v12 = vshrl.u32 %v1086_v33, 5  ;;  %v1091_v27 = vshll.u32 %v3462_v58, %v1088_v30  ;;  %vm1066_vm13 = vcmp.eq.s32.totalorder %v4197_v26, 0 }
 0x149   : > { %v951_v39 = vmul.f32 %v950_v57, %v948_v32  ;;  %v1238_v61 = vadd.s32 536870912, %v1237_v24  ;;  %v1092_v15 = vshrl.u32 %v3463_v60, %v1089_v34  ;;  %vm1069_vm14 = vcmp.eq.s32.totalorder %v4197_v26, 2 }
 0x14a   : > { %v1094_v13 = vshll.u32 %v3463_v60, %v1088_v30  ;;  %v1095_v52 = vshrl.u32 %v3464_v63, %v1089_v34  ;;  %v1098_v18 = vshrl.u32 %v3465_v1, %v1089_v34  ;;  %v1101_v46 = vshrl.u32 %v3466_v3, %v1089_v34 }
 0x14b   : > { %v952_v40 = vxor.u32 2147483648, %v951_v39  ;;  %v4222_v19 = vshrl.u32 %v1238_v61, 30  ;;  %v1097_v55 = vshll.u32 %v3464_v63, %v1088_v30  ;;  %v1100_v62 = vshll.u32 %v3465_v1, %v1088_v30  ;;  %v3339_v11 = vpop.eup %3338 }
 0x14c   : > { %v1093_v50 = vor.u32 %v1092_v15, %v1091_v27  ;;  %v1096_v25 = vor.u32 %v1095_v52, %v1094_v13  ;;  %v1103_v8 = vshll.u32 %v3466_v3, %v1088_v30  ;;  %v1104_v33 = vshrl.u32 %v3467_v10, %v1089_v34 }
 0x14d   : > { %vm1065_vm15 = vcmp.lt.s32.totalorder %v4197_v26, 2  ;;  %v953_v28 = vsel %vm870_vm4, %v952_v40, %v951_v39  ;;  %v1240_v29 = vshll.u32 %v4222_v19, 30  ;;  %v1099_v21 = vor.u32 %v1098_v18, %v1097_v55 }
 0x14e   : > { %v1102_v56 = vor.u32 %v1101_v46, %v1100_v62  ;;  %v1070_v47 = vxor.u32 2147483648, %v4186_v42  ;;  %v956_v38 = vsel %vm4160_vm8, %v3922_v9, %v953_v28  ;;  %v1105_v16 = vor.u32 %v1104_v33, %v1103_v8 }
 0x14f   : > { %v4236_v20 = vshll.u32 %v1082_v7, 8  ;;  %v1067_v0 = vxor.u32 2147483648, %v3339_v11  ;;  %3340 = vcosq.f32 %v956_v38  ;;  %v4238_v30 = vsub.s32 %v1237_v24, %v1240_v29 }
 0x150   : > { %v4240_v17 = vadd.f32 %v444_v35, %v385_v36  ;;  %vm1063_vm0 = vweird.f32 %v3850_v51  ;;  %3342 = vsinq.f32 %v956_v38  ;;  %vm1106_vm1 = vcmp.lt.s32.totalorder %v4212_v12, 1 }
 0x151   : > { %vm1108_vm2 = vcmp.lt.s32.totalorder %v4212_v12, 3  ;;  %vm1109_vm3 = vcmp.lt.s32.totalorder %v4212_v12, 4  ;;  %v1243_v45 = vsub.s32 0, %v4238_v30  ;;  %v1114_v57 = vsel %vm1106_vm1, %v1093_v50, %v1096_v25 }
 0x152   : > { %v1111_v32 = vsel %vm1109_vm3, %v1099_v21, 2102212464  ;;  %v1115_v7 = vsel %vm1109_vm3, %v1102_v56, 920167782  ;;  %v1090_v39 = vshrl.u32 %v3462_v58, %v1089_v34  ;;  %v1118_v24 = vsel %vm1106_vm1, %v1096_v25, %v1099_v21 }
 0x153   : > { %v1116_v36 = vsel %vm1108_vm2, %v1099_v21, %v1115_v7  ;;  %v1119_v61 = vsel %vm1109_vm3, %v1105_v16, 1326507024  ;;  %v1068_v27 = vsel %vm1066_vm13, %v4186_v42, %v1067_v0  ;;  %v1071_v15 = vsel %vm1069_vm14, %v1070_v47, %v3339_v11  ;;  %v439_v7 = vpop.permute.xlu0 %438 }
 0x154   : > { %v2750_v13 = vmin.u32 %v1243_v45, %v4238_v30  ;;  %vm1107_vm4 = vcmp.lt.s32.totalorder %v4212_v12, 2  ;;  %v1110_v52 = vsel %vm1106_vm1, %v1090_v39, %v1093_v50  ;;  %v1112_v34 = vsel %vm1108_vm2, %v1096_v25, %v1111_v32 }
 0x155   : > { %v1117_v18 = vsel %vm1107_vm4, %v1114_v57, %v1116_v36  ;;  %v1120_v46 = vsel %vm1108_vm2, %v1102_v56, %v1119_v61  ;;  %vm962_vm5 = vcmp.lt.s32.totalorder %v4210_v5, 2  ;;  %v1072_v11 = vsel %vm1065_vm15, %v1068_v27, %v1071_v15 }
 0x156   : > { %v1245_v42 = vclz %v2750_v13  ;;  %v1121_v40 = vsel %vm1107_vm4, %v1118_v24, %v1120_v46  ;;  %v4267_v55 = vmul.u32.u64.low %v4236_v20, %v1117_v18  ;;  %v4268_v62 = vmul.u32.u64.high %v4236_v20, %v1117_v18, %v4267_v55 }
 0x157   : > { %vm960_vm6 = vweird.f32 %v3922_v9  ;;  %v4275_v50 = vmul.u32.u64.low %v4236_v20, %v1121_v40  ;;  %v4276_v25 = vmul.u32.u64.high %v4236_v20, %v1121_v40, %v4275_v50  ;;  %v1386_v8 = vand.u32 2139095040, %v4240_v17 }
 0x158   : > { %vm963_vm7 = vcmp.eq.s32.totalorder %v4210_v5, 0  ;;  %vm1179_vm8 = vcmp.lt.s32.totalorder %v4048_v53, 0  ;;  %v2751_v33 = vadd.s32 4294967294, %v1245_v42  ;;  %v1113_v35 = vsel %vm1107_vm4, %v1110_v52, %v1112_v34 }
 0x159   : > { %v1383_v28 = vand.u32 2147483647, %v4240_v17  ;;  %vm966_vm9 = vcmp.eq.s32.totalorder %v4210_v5, 2  ;;  %v1233_v26 = vadd.s32 %v4173_v43, %v4170_v48  ;;  %v1387_v29 = vshrl.u32 %v1386_v8, 23  ;;  %v3341_v56 = vpop.eup %3340 }
 0x15a   : > { %v4291_v21 = vpack.c.bf16 %v1499_v31, %v1496_v14  ;;  %v4295_v47 = vsel %vm1063_vm0, nan, %v1072_v11  ;;  %vm2752_vm10 = vcmp.lt.s32.totalorder %v2751_v33, 0  ;;  %v1263_v12 = vsub.s32 4, %v4222_v19  ;;  %v3343_v16 = vpop.eup %3342 }
 0x15b   : > { %v1132_v38 = vadd.s32 1, %v4268_v62  ;;  %v967_v0 = vxor.u32 2147483648, %v3341_v56  ;;  %v1248_v48 = vsel %vm2752_vm10, 0, %v2751_v33  ;;  %v1129_v43 = vmul.u32 %v4236_v20, %v1113_v35 }
 0x15c   : > { %vm1131_vm11 = vc.u32 %v4276_v25, %v4267_v55  ;;  %3039 = vmatprep.subr.bf16.mxu1 %v4291_v21  ;;  %3099 = vmatprep.subr.bf16.mxu0 %v4291_v21  ;;  %v964_v51 = vxor.u32 2147483648, %v3343_v16  ;;  %v1249_v45 = vsub.s32 32, %v1248_v48  ;;  %v1253_v32 = vsub.s32 4294967266, %v1248_v48 }
 0x15d   : > { %v1390_v57 = vand.u32 8388607, %v1383_v28  ;;  %3041 = vmatpush3.bf16.msra.mxu1 %v4291_v21  ;;  %3101 = vmatpush3.bf16.msra.mxu0 %v4291_v21  ;;  %v968_v20 = vsel %vm966_vm9, %v967_v0, %v3343_v16  ;;  %v1250_v39 = vshll.u32 %v4238_v30, %v1248_v48  ;;  %v1133_v36 = vsel %vm1131_vm11, %v1132_v38, %v4268_v62 }
 0x15e   : > { %v2757_v24 = vadd.s32 4294967169, %v1387_v29  ;;  %3043 = vmatprep.subr.bf16.mxu1 %v4208_v59  ;;  %3103 = vmatprep.subr.bf16.mxu0 %v4208_v59  ;;  %v965_v61 = vsel %vm963_vm7, %v3341_v56, %v964_v51  ;;  %v1251_v27 = vshrl.u32 %v1233_v26, %v1249_v45  ;;  %v1254_v15 = vadd.s32 127, %v1253_v32 }
 0x15f   : > { %v1134_v13 = vadd.s32 %v1133_v36, %v1129_v43  ;;  %v1511_v52 = vand.u32 4294901760, %v4295_v47  ;;  %v969_v34 = vsel %vm962_vm5, %v965_v61, %v968_v20  ;;  %v4320_v30 = vadd.f32 %v439_v7, %v4202_v41 }
 0x160   : > { %v1393_v18 = vadd.s32 1, %v2757_v24  ;;  %v4324_v46 = vsel %vm960_vm6, nan, %v969_v34  ;;  %v1252_v42 = vor.u32 %v1251_v27, %v1250_v39  ;;  %v1255_v40 = vshll.u32 %v1254_v15, 23 }
 0x161   : > { %v1135_v62 = vadd.s32 536870912, %v1134_v13  ;;  %3045 = vmatpush3.bf16.msra.mxu1 %v4208_v59  ;;  %3105 = vmatpush3.bf16.msra.mxu0 %v4208_v59  ;;  %v1508_v11 = vand.u32 4294901760, %v4324_v46  ;;  %v4332_v5 = vsel %vm1179_vm8, %v1263_v12, %v4222_v19  ;;  %v1391_v9 = vor.u32 8388608, %v1390_v57 }
 0x162   : > { %vm1394_vm12 = vcmp.gt.s32.totalorder %v1393_v18, 0  ;;  %v1256_v41 = vor.u32 4788187, %v1255_v40  ;;  %v1280_v26 = vand.u32 2147483647, %v4320_v30  ;;  %v1259_v56 = vcvt.s32.f32 %v1252_v42 }
 0x163   : > { %v4334_v50 = vshrl.u32 %v1135_v62, 30  ;;  %v1395_v8 = vsel %vm1394_vm12, %v1393_v18, 0  ;;  %v4340_v33 = vpack.c.bf16 %v1511_v52, %v1508_v11  ;;  %vm4345_vm13 = vcmp.le.f32.partialorder %v1177_v54, 0.7853982 }
 0x164   : > { %v1397_v35 = vand.u32 31, %v1395_v8  ;;  %v1257_v29 = vand.u32 2147483647, %v1256_v41  ;;  %v1266_v38 = vsel %vm4345_vm13, 0, %v4332_v5  ;;  %v1130_v16 = vadd.s32 %v4267_v55, %v4276_v25 }
 0x165   : > { %v1137_v12 = vshll.u32 %v4334_v50, 30  ;;  %3047 = vmatprep.subr.bf16.mxu1 %v4340_v33  ;;  %3107 = vmatprep.subr.bf16.mxu0 %v4340_v33  ;;  %v4359_v43 = vshll.u32 %v1391_v9, 8  ;;  %v1283_v51 = vand.u32 2139095040, %v4320_v30  ;;  %v1396_v45 = vshrl.u32 %v1395_v8, 5 }
 0x166   : > { %v1398_v0 = vsub.s32 32, %v1397_v35  ;;  %v1260_v54 = vmul.f32 %v1259_v56, %v1257_v29  ;;  %3049 = vmatpush3.bf16.msra.mxu1 %v4340_v33  ;;  %v4367_v55 = vand.u32 8388607, %v1280_v26  ;;  %3109 = vmatpush3.bf16.msra.mxu0 %v4340_v33  ;;  %v1400_v20 = vshll.u32 %v3462_v58, %v1397_v35 }
 0x167   : > { %v4357_v48 = vsub.s32 %v1134_v13, %v1137_v12  ;;  %v1403_v36 = vshll.u32 %v3463_v60, %v1397_v35  ;;  %v1406_v24 = vshll.u32 %v3464_v63, %v1397_v35  ;;  %v1409_v61 = vshll.u32 %v3465_v1, %v1397_v35 }
 0x168   : > { %v1401_v32 = vshrl.u32 %v3463_v60, %v1398_v0  ;;  %v1404_v57 = vshrl.u32 %v3464_v63, %v1398_v0  ;;  %v1261_v25 = vxor.u32 2147483648, %v1260_v54  ;;  %v1407_v39 = vshrl.u32 %v3465_v1, %v1398_v0 }
 0x169   : > { %v1140_v7 = vsub.s32 0, %v4357_v48  ;;  %v1410_v27 = vshrl.u32 %v3466_v3, %v1398_v0  ;;  %v1284_v18 = vshrl.u32 %v1283_v51, 23  ;;  %vm1076_vm14 = vcmp.lt.s32.totalorder %v4096_v23, 0 }
 0x16a   : > { %v1262_v15 = vsel %vm1179_vm8, %v1261_v25, %v1260_v54  ;;  %v1402_v34 = vor.u32 %v1401_v32, %v1400_v20  ;;  %v1405_v40 = vor.u32 %v1404_v57, %v1403_v36  ;;  %v1408_v62 = vor.u32 %v1407_v39, %v1406_v24 }
 0x16b   : > { %v2746_v13 = vmin.u32 %v1140_v7, %v4357_v48  ;;  %v1265_v42 = vsel %vm4345_vm13, %v4048_v53, %v1262_v15  ;;  %v1411_v41 = vor.u32 %v1410_v27, %v1409_v61  ;;  %v1412_v8 = vshll.u32 %v3466_v3, %v1397_v35 }
 0x16c   : > { %3344 = vcosq.f32 %v1265_v42  ;;  %v1413_v29 = vshrl.u32 %v3467_v10, %v1398_v0  ;;  %v1160_v56 = vsub.s32 4, %v4334_v50  ;;  %v1399_v12 = vshrl.u32 %v3462_v58, %v1398_v0 }
 0x16d   : > { %v1142_v9 = vclz %v2746_v13  ;;  %3346 = vsinq.f32 %v1265_v42  ;;  %vm1415_vm15 = vcmp.lt.s32.totalorder %v1396_v45, 1  ;;  %vm1417_vm0 = vcmp.lt.s32.totalorder %v1396_v45, 3 }
 0x16e   : > { %v1414_v51 = vor.u32 %v1413_v29, %v1412_v8  ;;  %vm1418_vm1 = vcmp.lt.s32.totalorder %v1396_v45, 4  ;;  %v1423_v57 = vsel %vm1415_vm15, %v1402_v34, %v1405_v40  ;;  %v1427_v7 = vsel %vm1415_vm15, %v1405_v40, %v1408_v62 }
 0x16f   : > { %v2747_v54 = vadd.s32 4294967294, %v1142_v9  ;;  %v1420_v32 = vsel %vm1418_vm1, %v1408_v62, 2102212464  ;;  %v1424_v25 = vsel %vm1418_vm1, %v1411_v41, 920167782  ;;  %vm1416_vm3 = vcmp.lt.s32.totalorder %v1396_v45, 2 }
 0x170   : > { %v1425_v35 = vsel %vm1417_vm0, %v1408_v62, %v1424_v25  ;;  %v1428_v20 = vsel %vm1418_vm1, %v1414_v51, 1326507024  ;;  %v1419_v36 = vsel %vm1415_vm15, %v1399_v12, %v1402_v34  ;;  %v1421_v15 = vsel %vm1417_vm0, %v1405_v40, %v1420_v32 }
 0x171   : > { %vm2748_vm2 = vcmp.lt.s32.totalorder %v2747_v54, 0  ;;  %v1426_v24 = vsel %vm1416_vm3, %v1423_v57, %v1425_v35  ;;  %v1429_v0 = vsel %vm1417_vm0, %v1411_v41, %v1428_v20  ;;  %v2753_v41 = vadd.s32 4294967169, %v1284_v18 }
 0x172   : > { %v1145_v39 = vsel %vm2748_vm2, 0, %v2747_v54  ;;  %v1430_v13 = vsel %vm1416_vm3, %v1427_v7, %v1429_v0  ;;  %v4398_v8 = vmul.u32.u64.low %v4359_v43, %v1426_v24  ;;  %v4399_v62 = vmul.u32.u64.high %v4359_v43, %v1426_v24, %v4398_v8 }
 0x173   : > { %v1146_v61 = vsub.s32 32, %v1145_v39  ;;  %v1150_v27 = vsub.s32 4294967266, %v1145_v39  ;;  %v4394_v42 = vmul.u32.u64.low %v4359_v43, %v1430_v13  ;;  %v4395_v9 = vmul.u32.u64.high %v4359_v43, %v1430_v13, %v4394_v42 }
 0x174   : > { %v1147_v34 = vshll.u32 %v4357_v48, %v1145_v39  ;;  %vm4405_vm4 = vcmp.le.f32.partialorder %v1074_v37, 0.7853982  ;;  %v1161_v54 = vsel %vm1076_vm14, %v1160_v56, %v4334_v50  ;;  %v1422_v51 = vsel %vm1416_vm3, %v1419_v36, %v1421_v15 }
 0x175   : > { %v1148_v29 = vshrl.u32 %v1130_v16, %v1146_v61  ;;  %v1151_v12 = vadd.s32 127, %v1150_v27  ;;  %v4416_v32 = vsub.f32 %v3976_v4, %v1496_v14  ;;  %v1270_v37 = vand.u32 3, %v1266_v38 }
 0x176   : > { %v3345_v16 = vpop.eup %3344  ;;  %v1290_v57 = vadd.s32 1, %v2753_v41  ;;  %vm1440_vm5 = vc.u32 %v4395_v9, %v4398_v8  ;;  %v1441_v50 = vadd.s32 1, %v4399_v62  ;;  %v1288_v45 = vor.u32 8388608, %v4367_v55 }
 0x177   : > { %v1149_v48 = vor.u32 %v1148_v29, %v1147_v34  ;;  %v1152_v18 = vshll.u32 %v1151_v12, 23  ;;  %v3347_v25 = vpop.eup %3346  ;;  %v4429_v4 = vsub.f32 %v4072_v49, %v1499_v31  ;;  %v1163_v5 = vsel %vm4405_vm4, 0, %v1161_v54 }
 0x178   : > { %v1438_v19 = vmul.u32 %v4359_v43, %v1422_v51  ;;  %vm1291_vm6 = vcmp.gt.s32.totalorder %v1290_v57, 0  ;;  %v1276_v38 = vxor.u32 2147483648, %v3345_v16  ;;  %v1442_v56 = vsel %vm1440_vm5, %v1441_v50, %v4399_v62 }
 0x179   : > { %v1153_v14 = vor.u32 4788187, %v1152_v18  ;;  %v1292_v7 = vsel %vm1291_vm6, %v1290_v57, 0  ;;  %v1593_v35 = vand.u32 4294901760, %v4416_v32  ;;  %v1273_v20 = vxor.u32 2147483648, %v3347_v25 }
 0x17a   : > { %v1156_v39 = vcvt.s32.f32 %v1149_v48  ;;  %v1443_v36 = vadd.s32 %v1442_v56, %v1438_v19  ;;  %vm1271_vm7 = vcmp.lt.s32.totalorder %v1270_v37, 2  ;;  %vm1272_vm8 = vcmp.eq.s32.totalorder %v1270_v37, 0 }
 0x17b   : > { %v1154_v55 = vand.u32 2147483647, %v1153_v14  ;;  %vm1275_vm9 = vcmp.eq.s32.totalorder %v1270_v37, 2  ;;  %v4436_v49 = vand.u32 3, %v1163_v5  ;;  %v1294_v31 = vand.u32 31, %v1292_v7  ;;  %v1486_v14 = vld [vmem:[%s4774_s6] sm:$0xff] }
 0x17c   : > { %v1444_v0 = vadd.s32 536870912, %v1443_v36  ;;  %v4438_v43 = vshll.u32 %v1288_v45, 8  ;;  %v1600_v61 = vand.u32 4294901760, %v4429_v4  ;;  %v1277_v27 = vsel %vm1275_vm9, %v1276_v38, %v3347_v25 }
 0x17d   : > { %v1157_v24 = vmul.f32 %v1156_v39, %v1154_v55  ;;  %v1295_v15 = vsub.s32 32, %v1294_v31  ;;  %v1594_v13 = vsub.f32 %v4416_v32, %v1593_v35  ;;  %vm1488_vm10 = vcmask 654336  }
 0x17e   : > { %v1274_v42 = vsel %vm1272_vm8, %v3345_v16, %v1273_v20  ;;  %v4444_v34 = vshrl.u32 %v1444_v0, 30  ;;  %v1297_v29 = vshll.u32 %v3462_v58, %v1294_v31  ;;  %v1300_v41 = vshll.u32 %v3463_v60, %v1294_v31 }
 0x17f   : > { %v1158_v62 = vxor.u32 2147483648, %v1157_v24  ;;  %v1298_v12 = vshrl.u32 %v3463_v60, %v1295_v15  ;;  %v1301_v54 = vshrl.u32 %v3464_v63, %v1295_v15  ;;  %v1304_v51 = vshrl.u32 %v3465_v1, %v1295_v15 }
 0x180   : > { %v1446_v18 = vshll.u32 %v4444_v34, 30  ;;  %v1303_v16 = vshll.u32 %v3464_v63, %v1294_v31  ;;  %v1307_v57 = vshrl.u32 %v3466_v3, %v1295_v15  ;;  %v1293_v50 = vshrl.u32 %v1292_v7, 5 }
 0x181   : > { %v1159_v48 = vsel %vm1076_vm14, %v1158_v62, %v1157_v24  ;;  %v1299_v45 = vor.u32 %v1298_v12, %v1297_v29  ;;  %v1306_v60 = vshll.u32 %v3465_v1, %v1294_v31  ;;  %v1302_v19 = vor.u32 %v1301_v54, %v1300_v41 }
 0x182   : > { %v1162_v25 = vsel %vm4405_vm4, %v4096_v23, %v1159_v48  ;;  %v4463_v5 = vsub.s32 %v1443_v36, %v1446_v18  ;;  %v1305_v38 = vor.u32 %v1304_v51, %v1303_v16  ;;  %v1309_v56 = vshll.u32 %v3466_v3, %v1294_v31 }
 0x183   : > { %3348 = vcosq.f32 %v1162_v25  ;;  %v1308_v63 = vor.u32 %v1307_v57, %v1306_v60  ;;  %v1310_v40 = vshrl.u32 %v3467_v10, %v1295_v15  ;;  %v1278_v7 = vsel %vm1271_vm7, %v1274_v42, %v1277_v27 }
 0x184   : > { %3350 = vsinq.f32 %v1162_v25  ;;  %v1449_v20 = vsub.s32 0, %v4463_v5  ;;  %v1595_v1 = vand.u32 4294901760, %v1594_v13  ;;  %v1490_v55 = vsel %vm1488_vm10, %v1486_v14, 0 }
 0x185   : > { %vm1269_vm11 = vweird.f32 %v4048_v53  ;;  %v1296_v39 = vshrl.u32 %v3462_v58, %v1295_v15  ;;  %v1311_v36 = vor.u32 %v1310_v40, %v1309_v56  ;;  %vm1312_vm12 = vcmp.lt.s32.totalorder %v1293_v50, 1 }
 0x186   : > { %v1601_v24 = vsub.f32 %v4429_v4, %v1600_v61  ;;  %v2758_v0 = vmin.u32 %v1449_v20, %v4463_v5  ;;  %vm1314_vm13 = vcmp.lt.s32.totalorder %v1293_v50, 3  ;;  %vm1315_vm14 = vcmp.lt.s32.totalorder %v1293_v50, 4 }
 0x187   : > { %v1320_v3 = vsel %vm1312_vm12, %v1299_v45, %v1302_v19  ;;  %v1317_v10 = vsel %vm1315_vm14, %v1305_v38, 2102212464  ;;  %v1321_v37 = vsel %vm1315_vm14, %v1308_v63, 920167782  ;;  %v1324_v31 = vsel %vm1312_vm12, %v1302_v19, %v1305_v38 }
 0x188   : > { %v1325_v27 = vsel %vm1315_vm14, %v1311_v36, 1326507024  ;;  %v1451_v13 = vclz %v2758_v0  ;;  %vm1313_vm15 = vcmp.lt.s32.totalorder %v1293_v50, 2  ;;  %v1322_v42 = vsel %vm1314_vm13, %v1305_v38, %v1321_v37 }
 0x189   : > { %v1326_v62 = vsel %vm1314_vm13, %v1308_v63, %v1325_v27  ;;  %v1316_v58 = vsel %vm1312_vm12, %v1296_v39, %v1299_v45  ;;  %v1323_v15 = vsel %vm1313_vm15, %v1320_v3, %v1322_v42  ;;  %v1602_v12 = vand.u32 4294901760, %v1601_v24 }
 0x18a   : > { %v1327_v29 = vsel %vm1313_vm15, %v1324_v31, %v1326_v62  ;;  %v2759_v41 = vadd.s32 4294967294, %v1451_v13  ;;  %v1318_v54 = vsel %vm1314_vm13, %v1302_v19, %v1317_v10  ;;  %v4492_v25 = vpack.c.bf16 %v1600_v61, %v1593_v35 }
 0x18b   : > { %v4480_v51 = vmul.u32.u64.low %v4438_v43, %v1327_v29  ;;  %v4481_v48 = vmul.u32.u64.high %v4438_v43, %v1327_v29, %v4480_v51  ;;  %v4484_v18 = vmul.u32.u64.low %v4438_v43, %v1323_v15  ;;  %v4485_v16 = vmul.u32.u64.high %v4438_v43, %v1323_v15, %v4484_v18 }
 0x18c   : > { %v4488_v57 = vpack.c.bf16 %v1602_v12, %v1595_v1  ;;  %vm1168_vm0 = vcmp.lt.s32.totalorder %v4436_v49, 2  ;;  %vm1169_vm1 = vcmp.eq.s32.totalorder %v4436_v49, 0  ;;  %vm2760_vm2 = vcmp.lt.s32.totalorder %v2759_v41, 0 }
 0x18d   : > { %v3349_v45 = vpop.eup %3348  ;;  %v4496_v60 = vand.u32 4294901760, %v1490_v55  ;;  %vm1172_vm3 = vcmp.eq.s32.totalorder %v4436_v49, 2  ;;  %v1454_v38 = vsel %vm2760_vm2, 0, %v2759_v41  ;;  %v1319_v63 = vsel %vm1313_vm15, %v1316_v58, %v1318_v54 }
 0x18e   : > { %v3351_v14 = vpop.eup %3350  ;;  %v1173_v19 = vxor.u32 2147483648, %v3349_v45  ;;  %v4502_v56 = vsel %vm1269_vm11, nan, %v1278_v7  ;;  %v1455_v61 = vsub.s32 32, %v1454_v38  ;;  %v1459_v40 = vsub.s32 4294967266, %v1454_v38 }
 0x18f   : > { %v1170_v35 = vxor.u32 2147483648, %v3351_v14  ;;  %v1439_v1 = vadd.s32 %v4398_v8, %v4395_v9  ;;  %vm1337_vm4 = vc.u32 %v4481_v48, %v4484_v18  ;;  %v1338_v39 = vadd.s32 1, %v4485_v16 }
 0x190   : > { %v1174_v20 = vsel %vm1172_vm3, %v1173_v19, %v3351_v14  ;;  %v1460_v36 = vadd.s32 127, %v1459_v40  ;;  %v1335_v53 = vmul.u32 %v4438_v43, %v1319_v63  ;;  %v4513_v7 = vsub.f32 %v1490_v55, %v4496_v60 }
 0x191   : > { %v1171_v50 = vsel %vm1169_vm1, %v3349_v45, %v1170_v35  ;;  %v1517_v24 = vand.u32 4294901760, %v4502_v56  ;;  %vm1166_vm5 = vweird.f32 %v4096_v23  ;;  %v1339_v8 = vsel %vm1337_vm4, %v1338_v39, %v4485_v16 }
 0x192   : > { %v1175_v9 = vsel %vm1168_vm0, %v1171_v50, %v1174_v20  ;;  %v1457_v3 = vshrl.u32 %v1439_v1, %v1455_v61  ;;  %v1461_v10 = vshll.u32 %v1460_v36, 23  ;;  %v1340_v37 = vadd.s32 %v1339_v8, %v1335_v53 }
 0x193   : > { %v4520_v0 = vsel %vm1166_vm5, nan, %v1175_v9  ;;  %v1572_v43 = vand.u32 4294901760, %v4513_v7  ;;  %v1456_v55 = vshll.u32 %v4463_v5, %v1454_v38  ;;  %v1620_v5 = vsub.f32 %v4324_v46, %v1508_v11 }
 0x194   : > { %v1514_v31 = vand.u32 4294901760, %v4520_v0  ;;  %v1462_v27 = vor.u32 4788187, %v1461_v10  ;;  %v1341_v13 = vadd.s32 536870912, %v1340_v37  ;;  %v1627_v15 = vsub.f32 %v4295_v47, %v1511_v52 }
 0x195   : > { %v1573_v49 = vsub.f32 %v4513_v7, %v1572_v43  ;;  %2947 = vmatprep.mubr.f32.mxu0 %v1572_v43  ;;  %v1458_v42 = vor.u32 %v1457_v3, %v1456_v55  ;;  %v1621_v41 = vand.u32 4294901760, %v1620_v5  ;;  %v4551_v40 = vpack.c.bf16 %v4429_v4, %v4416_v32 }
 0x196   : > { %v4529_v23 = vpack.c.bf16 %v1517_v24, %v1514_v31  ;;  %v4532_v62 = vshrl.u32 %v1341_v13, 30  ;;  %v1463_v29 = vand.u32 2147483647, %v1462_v27  ;;  %v1628_v54 = vand.u32 4294901760, %v1627_v15 }
 0x197   : > { %v1574_v58 = vand.u32 4294901760, %v1573_v49  ;;  %v1465_v51 = vcvt.s32.f32 %v1458_v42  ;;  %v1622_v45 = vsub.f32 %v1620_v5, %v1621_v41  ;;  %v4553_v20 = vpack.c.bf16 %v1627_v15, %v1620_v5  ;;  %v1487_v42 = vld [vmem:[%s4774_s6 + $0x8] sm:$0xff] }
 0x198   : > { %3051 = vmatprep.subr.bf16.mxu1 %v4529_v23  ;;  %3111 = vmatprep.subr.bf16.mxu0 %v4529_v23  ;;  %v1343_v12 = vshll.u32 %v4532_v62, 30  ;;  %v1629_v14 = vsub.f32 %v1627_v15, %v1628_v54  ;;  %v4545_v19 = vpack.c.bf16 %v1628_v54, %v1621_v41  ;;  %vm1385_vm6 = vcmp.lt.s32.totalorder %v4240_v17, 0 }
 0x199   : > { %3053 = vmatpush3.bf16.msra.mxu1 %v4529_v23  ;;  %3113 = vmatpush3.bf16.msra.mxu0 %v4529_v23  ;;  %v1466_v46 = vmul.f32 %v1465_v51, %v1463_v29  ;;  %v1623_v38 = vand.u32 4294901760, %v1622_v45  ;;  %vm4560_vm8 = vcmp.le.f32.partialorder %v1383_v28, 0.7853982  ;;  %v1336_v32 = vadd.s32 %v4484_v18, %v4481_v48 }
 0x19a   : > { %2878 = vmatprep.mubr.f32.mxu1 %v1574_v58  ;;  %v1344_v16 = vsub.s32 %v1340_v37, %v1343_v12  ;;  %v1630_v47 = vand.u32 4294901760, %v1629_v14  ;;  %v1469_v55 = vsub.s32 4, %v4444_v34  ;;  %vm1282_vm9 = vcmp.lt.s32.totalorder %v4320_v30, 0 }
 0x19b   : > { %v1467_v35 = vxor.u32 2147483648, %v1466_v46  ;;  %vm4581_vm11 = vcmp.le.f32.partialorder %v1280_v26, 0.7853982  ;;  %v1493_v54 = vsel %vm1488_vm10, %v1487_v42, 0  ;;  %vm1475_vm14 = vweird.f32 %v4240_v17 }
 0x19c   : > { %v1346_v11 = vsub.s32 0, %v1344_v16  ;;  %v4547_v63 = vpack.c.bf16 %v1630_v47, %v1623_v38  ;;  %v1470_v48 = vsel %vm1385_vm6, %v1469_v55, %v4444_v34  ;;  %v1366_v34 = vsub.s32 4, %v4532_v62 }
 0x19d   : > { %v1468_v39 = vsel %vm1385_vm6, %v1467_v35, %v1466_v46  ;;  %v1472_v5 = vsel %vm4560_vm8, 0, %v1470_v48  ;;  %v4591_v14 = vand.u32 4294901760, %v1493_v54  ;;  %vm1372_vm2 = vweird.f32 %v4320_v30 }
 0x19e   : > { %v2754_v52 = vmin.u32 %v1346_v11, %v1344_v16  ;;  %v1471_v9 = vsel %vm4560_vm8, %v4240_v17, %v1468_v39  ;;  %v1476_v51 = vand.u32 3, %v1472_v5  ;;  %v1367_v26 = vsel %vm1282_vm9, %v1366_v34, %v4532_v62 }
 0x19f   : > { %3352 = vcosq.f32 %v1471_v9  ;;  %v1369_v46 = vsel %vm4581_vm11, 0, %v1367_v26  ;;  %v4596_v47 = vsub.f32 %v1493_v54, %v4591_v14  ;;  %v4606_v62 = vsub.f32 %v4118_v2, %v1505_v22 }
 0x1a0   : > { %v1348_v61 = vclz %v2754_v52  ;;  %3354 = vsinq.f32 %v1471_v9  ;;  %vm1478_vm12 = vcmp.eq.s32.totalorder %v1476_v51, 0  ;;  %vm1481_vm13 = vcmp.eq.s32.totalorder %v1476_v51, 2 }
 0x1a1   : > { %v4601_v52 = vsub.f32 %v4141_v44, %v1502_v6  ;;  %vm1477_vm10 = vcmp.lt.s32.totalorder %v1476_v51, 2  ;;  %v1373_v35 = vand.u32 3, %v1369_v46  ;;  %v1582_v36 = vand.u32 4294901760, %v4596_v47 }
 0x1a2   : > { %v2755_v1 = vadd.s32 4294967294, %v1348_v61  ;;  %v1614_v6 = vand.u32 4294901760, %v4606_v62 }
 0x1a3   : > { %vm1378_vm15 = vcmp.eq.s32.totalorder %v1373_v35, 2  ;;  %vm1375_vm0 = vcmp.eq.s32.totalorder %v1373_v35, 0  ;;  %vm1374_vm1 = vcmp.lt.s32.totalorder %v1373_v35, 2  ;;  %v1583_v17 = vsub.f32 %v4596_v47, %v1582_v36 }
 0x1a4   : > { %vm2756_vm7 = vcmp.lt.s32.totalorder %v2755_v1, 0 }
 0x1a5   : > { %v1351_v50 = vsel %vm2756_vm7, 0, %v2755_v1  ;;  %v1584_v55 = vand.u32 4294901760, %v1583_v17 }
 0x1a6   : > { %v1352_v4 = vsub.s32 32, %v1351_v50  ;;  %v1356_v53 = vsub.s32 4294967266, %v1351_v50  ;;  %v1353_v8 = vshll.u32 %v1344_v16, %v1351_v50 }
 0x1a8   : > { %v1354_v3 = vshrl.u32 %v1336_v32, %v1352_v4  ;;  %v1357_v10 = vadd.s32 127, %v1356_v53  ;;  %v1607_v32 = vand.u32 4294901760, %v4601_v52 }
 0x1a9   : > { %v3353_v58 = vpop.eup %3352 }
 0x1aa   : > { %v1355_v37 = vor.u32 %v1354_v3, %v1353_v8  ;;  %v1358_v43 = vshll.u32 %v1357_v10, 23  ;;  %v3355_v12 = vpop.eup %3354  ;;  %v1482_v45 = vxor.u32 2147483648, %v3353_v58  ;;  %v1608_v3 = vsub.f32 %v4601_v52, %v1607_v32 }
 0x1ab   : > { %v1479_v16 = vxor.u32 2147483648, %v3355_v12  ;;  %v1615_v10 = vsub.f32 %v4606_v62, %v1614_v6 }
 0x1ac   : > { %v1359_v28 = vor.u32 4788187, %v1358_v43  ;;  %v1362_v13 = vcvt.s32.f32 %v1355_v37  ;;  %v1483_v38 = vsel %vm1481_vm13, %v1482_v45, %v3355_v12  ;;  %v4619_v43 = vsub.f32 %v4520_v0, %v1514_v31 }
 0x1ad   : > { %v1480_v11 = vsel %vm1478_vm12, %v3353_v58, %v1479_v16 }
 0x1ae   : > { %v1360_v27 = vand.u32 2147483647, %v1359_v28  ;;  %v1484_v61 = vsel %vm1477_vm10, %v1480_v11, %v1483_v38  ;;  %v4624_v28 = vsub.f32 %v4502_v56, %v1517_v24  ;;  %v3122_v24 = vpack.c.bf16 %v1614_v6, %v1607_v32 }
 0x1af   : > { %v1485_v4 = vsel %vm1475_vm14, nan, %v1484_v61 }
 0x1b0   : > { %v1363_v49 = vmul.f32 %v1362_v13, %v1360_v27  ;;  %v1523_v22 = vand.u32 4294901760, %v1485_v4  ;;  %v1609_v27 = vand.u32 4294901760, %v1608_v3  ;;  %v1616_v13 = vand.u32 4294901760, %v1615_v10 }
 0x1b1   : > { %v1642_v48 = vand.u32 4294901760, %v4624_v28 }
 0x1b2   : > { %v1364_v18 = vxor.u32 2147483648, %v1363_v49  ;;  %v4634_v31 = vsub.f32 %v1485_v4, %v1523_v22  ;;  %v3062_v56 = vpack.c.bf16 %v1616_v13, %v1609_v27 }
 0x1b3   : > { %v1643_v42 = vsub.f32 %v4624_v28, %v1642_v48 }
 0x1b4   : > { %v1365_v29 = vsel %vm1282_vm9, %v1364_v18, %v1363_v49  ;;  %v1635_v49 = vand.u32 4294901760, %v4619_v43  ;;  %v1656_v5 = vand.u32 4294901760, %v4634_v31 }
 0x1b5   : > { %v1368_v41 = vsel %vm4581_vm11, %v4320_v30, %v1365_v29  ;;  %v1644_v29 = vand.u32 4294901760, %v1643_v42 }
 0x1b6   : > { %3356 = vcosq.f32 %v1368_v41  ;;  %v1636_v18 = vsub.f32 %v4619_v43, %v1635_v49  ;;  %v1657_v12 = vsub.f32 %v4634_v31, %v1656_v5 }
 0x1b7   : > { %3358 = vsinq.f32 %v1368_v41 }
 0x1b8   : > { %v1637_v15 = vand.u32 4294901760, %v1636_v18  ;;  %v1658_v54 = vand.u32 4294901760, %v1657_v12 }
 0x1c0   : > { %v3357_v1 = vpop.eup %3356 }
 0x1c1   : > { %v3359_v39 = vpop.eup %3358  ;;  %v1379_v50 = vxor.u32 2147483648, %v3357_v1 }
 0x1c2   : > { %v1376_v44 = vxor.u32 2147483648, %v3359_v39 }
 0x1c3   : > { %v1380_v53 = vsel %vm1378_vm15, %v1379_v50, %v3359_v39 }
 0x1c4   : > { %v1377_v2 = vsel %vm1375_vm0, %v3357_v1, %v1376_v44 }
 0x1c5   : > { %v1381_v9 = vsel %vm1374_vm1, %v1377_v2, %v1380_v53 }
 0x1c6   : > { %v1382_v8 = vsel %vm1372_vm2, nan, %v1381_v9 }
 0x1c7   : > { %v1520_v37 = vand.u32 4294901760, %v1382_v8 }
 0x1c9   : > { %v4626_v30 = vpack.c.bf16 %v1523_v22, %v1520_v37  ;;  %v4632_v0 = vsub.f32 %v1382_v8, %v1520_v37 }
 0x1cb   : > { %3055 = vmatprep.subr.bf16.mxu1 %v4626_v30  ;;  %3115 = vmatprep.subr.bf16.mxu0 %v4626_v30  ;;  %v1649_v58 = vand.u32 4294901760, %v4632_v0 }
 0x1cc   : > { %3057 = vmatpush3.bf16.msra.mxu1 %v4626_v30  ;;  %3117 = vmatpush3.bf16.msra.mxu0 %v4626_v30 }
 0x1cd   : > { %3059 = vmatprep.subr.bf16.mxu1 %v4488_v57  ;;  %3119 = vmatprep.subr.bf16.mxu0 %v4492_v25  ;;  %v1650_v34 = vsub.f32 %v4632_v0, %v1649_v58  ;;  %v3134_v16 = vpack.c.bf16 %v1656_v5, %v1649_v58 }
 0x1cf   : > { %2879 = vmatmul.mubr.f32.vlgmr.msra.gmra.mrb[0].mxu1 %v1584_v55  ;;  %2948 = vmatmul.mubr.f32.vlgmr.msra.gmra.mrb[0].mxu0 %v1582_v36  ;;  %v1651_v41 = vand.u32 4294901760, %v1650_v34 }
 0x1d0   : > { %3061 = vmatpush3.bf16.msra.mxu1 %v4488_v57  ;;  %3121 = vmatpush3.bf16.msra.mxu0 %v4492_v25  ;;  %v3070_v57 = vpack.c.bf16 %v1644_v29, %v1637_v15  ;;  %v3130_v25 = vpack.c.bf16 %v1642_v48, %v1635_v49 }
 0x1d1   : > { %3063 = vmatprep.subr.bf16.mxu1 %v3062_v56  ;;  %3123 = vmatprep.subr.bf16.mxu0 %v3122_v24  ;;  %v3074_v51 = vpack.c.bf16 %v1658_v54, %v1651_v41 }
 0x1d2   : > { %2901 = vmatprep.mubr.f32.mxu1 %v4496_v60  ;;  %2970 = vmatprep.mubr.f32.mxu0 %v4496_v60 }
 0x1d4   : > { %3065 = vmatpush3.bf16.msra.mxu1 %v3062_v56  ;;  %3125 = vmatpush3.bf16.msra.mxu0 %v3122_v24 }
 0x1d5   : > { %3067 = vmatprep.subr.bf16.mxu1 %v4547_v63  ;;  %3127 = vmatprep.subr.bf16.mxu0 %v4545_v19 }
 0x1d8   : > { %3069 = vmatpush3.bf16.msra.mxu1 %v4547_v63  ;;  %3129 = vmatpush3.bf16.msra.mxu0 %v4545_v19  ;;  %v3082_v19 = vpack.c.bf16 %v4606_v62, %v4601_v52  ;;  %v3090_v63 = vpack.c.bf16 %v4624_v28, %v4619_v43 }
 0x1d9   : > { %3071 = vmatprep.subr.bf16.mxu1 %v3070_v57  ;;  %3131 = vmatprep.subr.bf16.mxu0 %v3130_v25 }
 0x1dc   : > { %3073 = vmatpush3.bf16.msra.mxu1 %v3070_v57  ;;  %3133 = vmatpush3.bf16.msra.mxu0 %v3130_v25 }
 0x1dd   : > { %3075 = vmatprep.subr.bf16.mxu1 %v3074_v51  ;;  %3135 = vmatprep.subr.bf16.mxu0 %v3134_v16 }
 0x1e0   : > { %3077 = vmatpush3.bf16.msra.mxu1 %v3074_v51  ;;  %3137 = vmatpush3.bf16.msra.mxu0 %v3134_v16 }
 0x1e1   : > { %3079 = vmatprep.subr.bf16.mxu1 %v4551_v40  ;;  %3139 = vmatprep.subr.bf16.mxu0 %v4291_v21 }
 0x1e3   : > { %2902 = vmatmul.mubr.f32.vlgmr.msra.gmra.mrb[0].mxu1 %v4591_v14  ;;  %2971 = vmatmul.mubr.f32.vlgmr.msra.gmra.mrb[0].mxu0 %v4591_v14 }
 0x1e4   : > { %3081 = vmatpush3.bf16.msra.mxu1 %v4551_v40  ;;  %3141 = vmatpush3.bf16.msra.mxu0 %v4291_v21  ;;  %v3094_v21 = vpack.c.bf16 %v4634_v31, %v4632_v0 }
 0x1e5   : > { %3083 = vmatprep.subr.bf16.mxu1 %v3082_v19  ;;  %3143 = vmatprep.subr.bf16.mxu0 %v4208_v59 }
 0x1e6   : > { %2924 = vmatprep.mubr.f32.mxu1 %v4513_v7  ;;  %2993 = vmatprep.mubr.f32.mxu0 %v4496_v60 }
 0x1e8   : > { %3085 = vmatpush3.bf16.msra.mxu1 %v3082_v19  ;;  %3145 = vmatpush3.bf16.msra.mxu0 %v4208_v59 }
 0x1e9   : > { %3087 = vmatprep.subr.bf16.mxu1 %v4553_v20  ;;  %3147 = vmatprep.subr.bf16.mxu0 %v4340_v33 }
 0x1ec   : > { %3089 = vmatpush3.bf16.msra.mxu1 %v4553_v20  ;;  %3149 = vmatpush3.bf16.msra.mxu0 %v4340_v33 }
 0x1ed   : > { %3091 = vmatprep.subr.bf16.mxu1 %v3090_v63  ;;  %3151 = vmatprep.subr.bf16.mxu0 %v4529_v23 }
 0x1f0   : > { %3093 = vmatpush3.bf16.msra.mxu1 %v3090_v63  ;;  %3153 = vmatpush3.bf16.msra.mxu0 %v4529_v23 }
 0x1f1   : > { %3095 = vmatprep.subr.bf16.mxu1 %v3094_v21  ;;  %3155 = vmatprep.subr.bf16.mxu0 %v4626_v30 }
 0x1f4   : > { %3097 = vmatpush3.bf16.msra.mxu1 %v3094_v21  ;;  %3157 = vmatpush3.bf16.msra.mxu0 %v4626_v30 }
 0x1f7   : > { %2925 = vmatmul.mubr.f32.vlgmr.msra.gmra.mrb[0].mxu1 %v4596_v47  ;;  %2994 = vmatmul.mubr.f32.vlgmr.msra.gmra.mrb[0].mxu0 %v4591_v14 }
 0x2ca   : > { %v2926_v59 = vpop.f32.mrb[0].mxu1  ;;  %v2995_v33 = vpop.f32.mrb[0].mxu0 }
 0x2cb   : > { %v3176_v60 = vadd.f32 %v2995_v33, %v2926_v59  ;;  %v1805_v7 = vpop.f32.mrb[1].mxu1  ;;  %v2091_v40 = vpop.f32.mrb[1].mxu0 }
 0x2cc   : > { %v3177_v20 = vadd.f32 %v2091_v40, %v1805_v7 }
 0x2cd   : > { %2102 = vst [vmem:[#allocation2 + $0x8] sm:$0xff] %v3176_v60 }
 0x2ce   : > { %2101 = vst [vmem:[#allocation2] sm:$0xff] %v3177_v20 }
 0x2cf PF: > { %v2103_v23 = vld [vmem:[%s3598_s16] sm:$0xff]  ;;  %v3468_v45 = vmov 0   ;;  %vm2125_vm3 = vcmask 130048   ;;  %v3469_v62 = vmov 0.0   ;;  %v3470_v44 = vmov 0.0|0.0   ;;  %s3235_s13 = smul.u32 3, %s3443_s27 }
 0x2d0   : > { %3360 = vset.pattern.permute.xlu0 %v3468_v45  ;;  %v2106_v26 = vmul.f32 2.0, %v2103_v23  ;;  %v2762_v14 = vld [vmem:[%s4770_s2] ss:$0 sm:$0xff]  ;;  %3167 = vmatprep.subr.bf16.mxu0 %v3470_v44  ;;  %vm3471_vm5 = vmmov 0   ;;  %s2632_s29 = sshll.u32 %s294_s11, 4  ;;  %s4810_s27 = sand.u32 1, %s3435_s25   ;;  %s4713_s29 = int_to_ptr.vmem [resolvable:$true] %s2632_s29 }
 0x2d1   : > { %3158 = vmatprep.subr.bf16.mxu1 %v3470_v44  ;;  %3021 = vmatprep.mubr.msk.f32.mxu0 %vm3471_vm5, %v3469_v62  ;;  %v2763_v55 = vld [vmem:[%s4771_s3] ss:$0 sm:$0xff]  ;;  %s2628_s30 = sadd.s32 %s3447_s28, %s3235_s13  ;;  %s2617_s28 = scalar_lea.sflag [#allocation4], %s4810_s27 }
 0x2d2   : > { %v2108_v46 = vmul.f32 100.0, %v2106_v26  ;;  %3000 = vmatprep.mubr.msk.f32.mxu1 %vm3471_vm5, %v3469_v62  ;;  %s2765_s20 = sshll.u32 %s2628_s30, 7  ;;  %s3365_s17 = scalar_lea.vmem %s4713_s29, 128 }
 0x2d3   : > { %s4711_s23 = scalar_lea.hbm %s4775_s7, %s2765_s20  ;;  %p3366_p1 = scmp.ne.s32.totalorder %s4713_s29, %s3365_s17 }
 0x2d4   : > { %v2761_v11 = vadd.f32 -1.0, %v2108_v46  ;;  %v2151_v50 = vld [vmem:[#allocation2 + $0x8] sm:$0xff]  ;;  %s3472_s18 = smov [#allocation3]  }
 0x2d5   : > { %v2150_v39 = vld [vmem:[#allocation2] sm:$0xff]  ;;  %v2159_v32 = vand.u32 4294901760, %v2151_v50  ;;  %p3367_p2 = pnand %p3366_p1, %p3564_p3  ;;  %s3369_s22 = sshll.u32 %s3472_s18, 4  ;;  %s3370_s22 = int_to_ptr.vmem [resolvable:$false] %s3369_s22 }
 0x2d6   : > { %2112 = vperm.xlu0 %3360, %v2761_v11   ;;  %v2156_v36 = vand.u32 4294901760, %v2150_v39  ;;  %s3371_s9 = scalar_lea.vmem %s3370_s22, 256  ;;  %p3372_p5 = scmp.lt.s32.totalorder %s4713_s29, %s3370_s22 }
 0x2d7   : > { %v2241_v53 = vsub.f32 %v2151_v50, %v2159_v32  ;;  %p3368_p4 = pneg %p3367_p2  ;;  %p3373_p6 = scmp.lt.s32.totalorder %s3371_s9, %s3365_s17 }
 0x2d8   : > { %v3159_v4 = vpack.c.bf16 %v2159_v32, %v2156_v36  ;;  %v2234_v6 = vsub.f32 %v2150_v39, %v2156_v36 }
 0x2d9   : > { %v2242_v22 = vand.u32 4294901760, %v2241_v53  ;;  %p3374_p7 = por %p3373_p6, %p3372_p5 }
 0x2da   : > { %3169 = vmatpush3.bf16.msra.mxu0 %v3159_v4  ;;  %3160 = vmatpush3.bf16.msra.mxu1 %v3159_v4  ;;  %v2235_v2 = vand.u32 4294901760, %v2234_v6  ;;  %v3165_v43 = vpack.c.bf16 %v2241_v53, %v2234_v6 }
 0x2db   : > { %3161 = vmatprep.subr.bf16.mxu1 %v3470_v44  ;;  %3170 = vmatprep.subr.bf16.mxu0 %v3470_v44  ;;  %v2243_v8 = vsub.f32 %v2241_v53, %v2242_v22  ;;  %p3375_p9 = pnand %p3374_p7, %p3368_p4 }
 0x2dc   : > { %v2236_v9 = vsub.f32 %v2234_v6, %v2235_v2  ;;  %v3171_v17 = vpack.c.bf16 %v2242_v22, %v2235_v2 }
 0x2dd   : > { %v2244_v10 = vand.u32 4294901760, %v2243_v8 }
 0x2de   : > { %v2237_v3 = vand.u32 4294901760, %v2236_v9 }
 0x2e0   : > { %v3162_v37 = vpack.c.bf16 %v2244_v10, %v2237_v3 }
 0x355   : > { %v2113_v38 = vpop.permute.xlu0 %2112 }
 0x356   : > { %v2121_v47 = vsub.f32 %v2113_v38, %v2762_v14 }
 0x358   : > { %v2122_v52 = vand.u32 2147483647, %v2121_v47  ;;  %3361 = vrcp.f32 %v2121_v47 }
 0x35a   : > { %vm4684_vm4 = vcmp.lt.f32.partialorder %v2122_v52, 1e-14 }
 0x35b   : > { %v2124_v61 = vsel %vm4684_vm4, 1.0, %v3469_v62 }
 0x35c   : > { %v2126_v1 = vsel %vm2125_vm3, %v2124_v61, -inf }
 0x35d   : > { %2127 = vmax.xlane.f32.xlu0 %v2126_v1 }
 0x362   : > { %v3362_v30 = vpop.eup %3361 }
 0x3ea   : > { %v2128_v28 = vpop.xlane.xlu0 %2127 }
 0x3eb   : > { %vm2129_vm6 = vcmp.gt.f32.partialorder %v2128_v28, 0.0 }
 0x3ec   : > { %v2134_v27 = vsel %vm2129_vm6, 0.0, %v3362_v30 }
 0x3ed   : > { %v2135_v13 = vsel %vm4684_vm4, 1.0, %v2134_v27 }
 0x3ee   : > { %v2142_v49 = vmul.f32 %v2763_v55, %v2135_v13 }
 0x3f0   : > { %v2143_v48 = vsel %vm2125_vm3, %v2142_v49, 0.0  ;;  %v2153_v0 = vsel %vm2125_vm3, %v2142_v49, 0 }
 0x3f1   : > { %v2222_v31 = vand.u32 4294901760, %v2153_v0  ;;  %2144 = vadd.xlane.f32.xlu1 %v2143_v48 }
 0x3f3   : > { %v2223_v56 = vsub.f32 %v2153_v0, %v2222_v31 }
 0x3f5   : > { %v2224_v24 = vand.u32 4294901760, %v2223_v56 }
 0x3f7   : > { %3022 = vmatmul.mubr.f32.vlgmr.msra.gmra.mrb[0].mxu0 %v2224_v24  ;;  %v2225_v18 = vsub.f32 %v2223_v56, %v2224_v24 }
 0x3f8   : > { %3172 = vmatpush3.bf16.msra.mxu0 %v3171_v17  ;;  %3028 = vmatprep.mubr.msk.f32.mxu0 %vm3471_vm5, %v3469_v62 }
 0x3f9   : > { %v2226_v42 = vand.u32 4294901760, %v2225_v18  ;;  %3173 = vmatprep.subr.bf16.mxu0 %v3470_v44 }
 0x3fb   : > { %3001 = vmatmul.mubr.f32.vlgmr.msra.gmra.mrb[0].mxu1 %v2226_v42 }
 0x3fc   : > { %3163 = vmatpush3.bf16.msra.mxu1 %v3162_v37  ;;  %3007 = vmatprep.mubr.msk.f32.mxu1 %vm3471_vm5, %v3469_v62 }
 0x3fd   : > { %3164 = vmatprep.subr.bf16.mxu1 %v3470_v44 }
 0x3ff   : > { %3029 = vmatmul.mubr.f32.vlgmr.msra.gmra.mrb[0].mxu0 %v2222_v31 }
 0x400   : > { %3175 = vmatpush3.bf16.msra.mxu0 %v3159_v4  ;;  %3035 = vmatprep.mubr.msk.f32.mxu0 %vm3471_vm5, %v3469_v62 }
 0x403   : > { %3008 = vmatmul.mubr.f32.vlgmr.msra.gmra.mrb[0].mxu1 %v2222_v31 }
 0x404   : > { %3166 = vmatpush3.bf16.msra.mxu1 %v3165_v43  ;;  %3014 = vmatprep.mubr.msk.f32.mxu1 %vm3471_vm5, %v3469_v62 }
 0x407   : > { %3036 = vmatmul.mubr.f32.vlgmr.msra.gmra.mrb[0].mxu0 %v2222_v31 }
 0x40b   : > { %3015 = vmatmul.mubr.f32.vlgmr.msra.gmra.mrb[0].mxu1 %v2223_v56 }
 0x47e   : > { %v2145_v58 = vpop.xlane.xlu1 %2144 }
 0x47f   : > { %3363 = vrcp.f32 %v2145_v58 }
 0x489   : > { %v3364_v5 = vpop.eup %3363 }
 0x48a   : > { %v2147_v15 = vmul.f32 %v3364_v5, %v2145_v58 }
 0x48c   : > { %v2148_v34 = vsub.f32 2.0, %v2147_v15 }
 0x48e   : > { %v2149_v25 = vmul.f32 %v3364_v5, %v2148_v34 }
 0x4da   : > { %v2610_v29 = vpop.f32.mrb[0].mxu0 }
 0x4db   : > { %v3037_v12 = vpop.f32.mrb[1].mxu0 }
 0x4de   : > { %v2385_v57 = vpop.f32.mrb[0].mxu1 }
 0x4df   : > { %v3186_v41 = vadd.f32 %v2610_v29, %v2385_v57  ;;  %v3016_v54 = vpop.f32.mrb[1].mxu1 }
 0x4e1   : > { %v2614_v51 = vmul.f32 %v3186_v41, %v2149_v25 }
 0x4e3   : > { %2615 = vst [vmem:[%s294_s11] sm:$0xff] %v2614_v51 }
 0x4e4   : > { %3378 = shalt.err (!%p3375_p9)
}
 0x4e5   : > { %s3379_s11 = scalar_lea.hbm %s4711_s23, 128  ;;  %s3383_s10 = scalar_lea.hbm %s4775_s7, 1152 }
 0x4e6   : > { %p3380_p10 = scmp.ne.s32.totalorder %s4711_s23, %s3379_s11  ;;  %p3384_p13 = scmp.lt.u32.totalorder %s4711_s23, %s4775_s7 }
 0x4e7   : > { %p3385_p0 = scmp.lt.u32.totalorder %s3383_s10, %s3379_s11  ;;  %p3387_p2 = scmp.lt.u32.totalorder %s3379_s11, %s4711_s23 }
 0x4e8   : > { %p3381_p11 = pnand %p3380_p10, %p3564_p3 }
 0x4e9   : > { %p3386_p1 = por %p3385_p0, %p3384_p13 }
 0x4ea   : > { %p3382_p12 = pneg %p3381_p11 }
 0x4eb   : > { %p3388_p4 = por %p3387_p2, %p3386_p1 }
 0x4ed   : > { %p3389_p5 = pnand %p3388_p4, %p3382_p12 }
 0x4ef   : > { %3392 = shalt.err (!%p3389_p5)
}
 0x4f0   : > { %3236 = dma.vmem_to_hbm [thread:$0]  (%p3564_p3), %s4713_s29, 128, %s4711_s23, %s2617_s28  }
 0x4f1 PF: > { %p3242_p6 = scmp.ge.s32.totalorder %s3459_s8, 2  ;;  %s2644_s20 = sand.u32 1, %s3431_s24  }
 0x4f2   : > { %s2645_s19 = scalar_lea.sflag [#allocation4], %s2644_s20 }
 0x4f3   : > { %p3239_p7 = pnand %p3242_p6, %p3573_p8 }
 0x4f5   : > { %3426 = dma.done.wait (!%p3239_p7), %s2645_s19, 128  }
 0x4f6   : > { %3428 = vsyncadd (!%p3239_p7), %s2645_s19, 4294967168  ;;  %s20_s8 = sadd.s32 1, %s3459_s8   ;;  %s4811_s14 = sld [smem:[#allocation10_spill]] }
 0x4f7   : > { %p17_p9 = scmp.ge.s32.totalorder %s20_s8, 11   ;;  %s4812_s27 = sld [smem:[#allocation6_spill]] }
 0x4f8   : > { %s4813_s28 = sld [smem:[#allocation7_spill]]  ;;  %s4814_s29 = sld [smem:[#allocation8_spill]] }
 0x4f9   : > { %s4815_s30 = sld [smem:[#allocation9_spill]]  ;;  %s4816_s24 = smov %s3435_s25 }
 0x4fa   : > { %s4817_s25 = smov %s3439_s26  ;;  %19 = sbr.rel (!%p17_p9) target bundleno = 5 (0x5), region = 90 }
 0x4fc   : > { %s4818_s26 = smov %s4811_s14 }
 0x501   :  { %2650 = vsyncpa [#allocation4], 1 }
 0x502   :  { %2652 = vsyncpa [#allocation4 + $0x1], 1 }

</bundles_post_ra>
